<compile_context>
chip_gen: v7x
topology: tpu7x:2x2x1
jax: 0.10.0
libtpu: 0.0.40
codegen_flags: <defaults>
</compile_context>

<pallas_src>
import functools
import math

import jax
import jax.numpy as jnp
import numpy as np
from jax import lax
from jax.experimental import pallas as pl
from jax.experimental.pallas import tpu as pltpu


# ----------------------------------------------------------------------------
# Fused kernel: 3x (conv [+bias] [+ReLU]) on a per-batch-element block.
# Activation layout: [ (H + 2p) * (W + 2p), C ]  (spatial flat on sublanes,
# channels on lanes), with a zero halo ring of width p so every tap read is an
# in-bounds slice and zero-padding semantics come for free.
# ----------------------------------------------------------------------------
def _fused_kernel(*refs, metas, n_const):
    x_ref = refs[0]                       # layer-0 input, already ring-padded
    const_refs = refs[1:1 + n_const]      # per-layer weights / biases
    o_ref = refs[1 + n_const]             # [S_final, Cout]
    scratch_refs = refs[2 + n_const:]     # ring-padded inter-layer activations

    ci = 0
    si = 0
    in_ref = x_ref
    for m in metas:
        k, s = m["k"], m["s"]
        Ho, Wo = m["Ho"], m["Wo"]
        Wp_in = m["Wp_in"]
        p_out, Wp_out = m["p_out"], m["Wp_out"]
        relu = m["relu"]
        is_last = m["is_last"]
        cout = m["cout"]

        w_ref = const_refs[ci]; ci += 1           # [k*k, Cin_pad, Cout]
        b_ref = None
        if m["has_bias"]:
            b_ref = const_refs[ci]; ci += 1       # [1, Cout] (f32)

        if is_last:
            dst_ref = o_ref
        else:
            dst_ref = scratch_refs[si]; si += 1
            # Zero the halo ring (the interior is fully overwritten below).
            dst_ref[...] = jnp.zeros(dst_ref.shape, dst_ref.dtype)

        def row_body(ho, carry, *, k=k, s=s, Wo=Wo, Wp_in=Wp_in, p_out=p_out,
                     Wp_out=Wp_out, relu=relu, is_last=is_last, cout=cout,
                     in_ref=in_ref, dst_ref=dst_ref, w_ref=w_ref, b_ref=b_ref):
            acc = jnp.zeros((Wo, cout), jnp.float32)
            # Per-tap accumulation: no [T*Cin, S] patch tensor, K=Cin per dot.
            for kh in range(k):
                base = (ho * s + kh) * Wp_in
                for kw in range(k):
                    t = kh * k + kw
                    if s == 1:
                        tap = in_ref[pl.ds(base + kw, Wo), :]
                    else:
                        tap = in_ref[pl.ds(base + kw, Wo, stride=s), :]
                    acc = acc + jnp.dot(tap, w_ref[t],
                                        preferred_element_type=jnp.float32)
            if b_ref is not None:
                acc = acc + b_ref[...]            # f32 bias add
            if relu:
                acc = jnp.maximum(acc, 0.0)       # f32 ReLU
            if is_last:
                dst_ref[pl.ds(ho * Wo, Wo), :] = acc.astype(dst_ref.dtype)
            else:
                dst0 = (ho + p_out) * Wp_out + p_out
                dst_ref[pl.ds(dst0, Wo), :] = acc.astype(dst_ref.dtype)
            return carry

        lax.fori_loop(0, Ho, row_body, 0)
        in_ref = dst_ref


# ----------------------------------------------------------------------------
# Host-side helpers
# ----------------------------------------------------------------------------
def _round_up(x, m):
    return (x + m - 1) // m * m


def _const_spec(arr):
    zeros = (0,) * arr.ndim
    return pl.BlockSpec(arr.shape, lambda n, z=zeros: z)


def _pick_vmem_limit_bytes():
    """Generation-aware VMEM budget (fallback: 32 MiB, safe on all parts)."""
    try:
        cap = int(pltpu.get_tpu_info().vmem_capacity_bytes)
        return max(16 * 2**20, min(int(cap * 0.45), 96 * 2**20))
    except Exception:
        return 32 * 2**20


# ----------------------------------------------------------------------------
# Module: parameter construction + fused forward builder
# ----------------------------------------------------------------------------
def init_params(key, strides, kernels, in_channels, inter_channels):
    """Xavier-normal(gain=sqrt(2)) weights, bias=0.01 (no bias on last layer)."""
    params = []
    n_layers = len(strides)
    for i, (s, k) in enumerate(zip(strides, kernels)):
        cin = in_channels if i == 0 else inter_channels
        cout = inter_channels
        use_bias = i < n_layers - 1
        fan_in = cin * k * k
        fan_out = cout * k * k
        std = math.sqrt(2.0) * math.sqrt(2.0 / (fan_in + fan_out))
        key, sub = jax.random.split(key)
        # weight stored as [kh, kw, cin, cout]
        w = std * jax.random.normal(sub, (k, k, cin, cout), dtype=jnp.float32)
        b = jnp.full((cout, 1), 0.01, jnp.float32) if use_bias else None
        params.append(dict(w=w, b=b, k=k, s=s, use_relu=use_bias))
    return params


def build_hyperprior_analysis(params, in_hw, compute_dtype=jnp.bfloat16):
    """Builds a fused forward fn for a fixed input spatial size (NCHW in/out)."""
    H, W = in_hw
    L = len(params)
    metas, const_inputs, const_specs, scratch_shapes = [], [], [], []
    Hc, Wc = H, W
    cin0 = params[0]["w"].shape[2]
    cin0_pad = _round_up(cin0, 8)
    cin_cur = cin0_pad
    flops_per_item = 0

    for i, layer in enumerate(params):
        k, s = layer["k"], layer["s"]
        p = k // 2
        cin, cout = layer["w"].shape[2], layer["w"].shape[3]
        Ho = (Hc + 2 * p - k) // s + 1
        Wo = (Wc + 2 * p - k) // s + 1
        Wp_in = Wc + 2 * p

        # Weight const [k*k, Cin_pad, Cout], pre-cast to compute_dtype on host.
        w = np.asarray(layer["w"], np.float32).reshape(k * k, cin, cout)
        if cin_cur > cin:
            w = np.concatenate(
                [w, np.zeros((k * k, cin_cur - cin, cout), np.float32)], axis=1)
        w_c = jnp.asarray(w, dtype=compute_dtype)
        const_inputs.append(w_c); const_specs.append(_const_spec(w_c))

        has_bias = layer["b"] is not None
        if has_bias:
            b = jnp.asarray(np.asarray(layer["b"], np.float32).reshape(1, cout))
            const_inputs.append(b); const_specs.append(_const_spec(b))

        is_last = i == L - 1
        if not is_last:
            p_next = params[i + 1]["k"] // 2
            Wp_out = Wo + 2 * p_next
            Hp_out = Ho + 2 * p_next
            scratch_shapes.append(
                pltpu.VMEM((Hp_out * Wp_out, cout), compute_dtype))
        else:
            p_next, Wp_out = 0, Wo

        metas.append(dict(k=k, s=s, Ho=Ho, Wo=Wo, Wp_in=Wp_in, p_out=p_next,
                          Wp_out=Wp_out, has_bias=has_bias,
                          relu=layer["use_relu"], is_last=is_last, cout=cout))
        flops_per_item += 2 * (k * k) * cin_cur * cout * Ho * Wo
        Hc, Wc = Ho, Wo
        cin_cur = cout

    p0 = params[0]["k"] // 2
    Hp0, Wp0 = H + 2 * p0, W + 2 * p0
    cout_final = params[-1]["w"].shape[3]
    Hf, Wf = Hc, Wc
    S_final = Hf * Wf

    kernel = functools.partial(_fused_kernel, metas=tuple(metas),
                               n_const=len(const_inputs))
    const_bytes = sum(int(c.size) * c.dtype.itemsize for c in const_inputs)
    vmem_limit = _pick_vmem_limit_bytes()

    def forward(x_nchw):
        N, C, Hx, Wx = x_nchw.shape
        assert (C, Hx, Wx) == (cin0, H, W), "forward built for a fixed input shape"
        # Host-side: pad channels to a multiple of 8, add the layer-0 zero halo
        # ring, and go to the kernel's native [spatial, channel] layout.
        x_p = jnp.pad(x_nchw, ((0, 0), (0, cin0_pad - C), (p0, p0), (p0, p0)))
        x_t = jnp.transpose(x_p, (0, 2, 3, 1)).reshape(N, Hp0 * Wp0, cin0_pad)
        x_t = x_t.astype(compute_dtype)

        grid_spec = pltpu.PrefetchScalarGridSpec(
            num_scalar_prefetch=0,
            grid=(N,),
            in_specs=[pl.BlockSpec((None, Hp0 * Wp0, cin0_pad),
                                   lambda n: (n, 0, 0))] + const_specs,
            out_specs=pl.BlockSpec((None, S_final, cout_final),
                                   lambda n: (n, 0, 0)),
            scratch_shapes=scratch_shapes,
        )
        bytes_accessed = (N * Hp0 * Wp0 * cin0_pad * x_t.dtype.itemsize
                          + const_bytes
                          + N * S_final * cout_final * 4)
        out = pl.pallas_call(
            kernel,
            out_shape=jax.ShapeDtypeStruct((N, S_final, cout_final), jnp.float32),
            grid_spec=grid_spec,
            compiler_params=pltpu.CompilerParams(
                dimension_semantics=("parallel",),   # batch shards across TCs
                vmem_limit_bytes=vmem_limit,
            ),
            cost_estimate=pl.CostEstimate(flops=int(N * flops_per_item),
                                          transcendentals=0,
                                          bytes_accessed=int(bytes_accessed)),
        )(x_t, *const_inputs)
        # [N, Hf*Wf, Cout] -> NCHW
        return jnp.transpose(out.reshape(N, Hf, Wf, cout_final), (0, 3, 1, 2))

    return forward


# ----------------------------------------------------------------------------
# Reference (pure JAX) for the sanity check
# ----------------------------------------------------------------------------
def reference_forward(x_nchw, params):
    x = x_nchw
    for layer in params:
        k, s = layer["k"], layer["s"]
        w_oihw = jnp.transpose(layer["w"], (3, 2, 0, 1))    # [cout, cin, kh, kw]
        x = jax.lax.conv_general_dilated(
            x, w_oihw, window_strides=(s, s),
            padding=[(k // 2, k // 2), (k // 2, k // 2)],
            dimension_numbers=("NCHW", "OIHW", "NCHW"))
        if layer["b"] is not None:
            x = x + layer["b"].reshape(1, -1, 1, 1)
        if layer["use_relu"]:
            x = jnp.maximum(x, 0.0)
    return x


if __name__ == "__main__":
    # Synthetic cfg: STRIDES=(1,2,2), KERNELS=(3,5,5),
    # LATENT_CHANNELS=4, INTER_CHANNELS=8.
    strides = (1, 2, 2)
    kernels = (3, 5, 5)
    latent_channels = 4
    inter_channels = 8

    key = jax.random.PRNGKey(0)
    kp, kx = jax.random.split(key)
    params = init_params(kp, strides, kernels, latent_channels, inter_channels)

    x = jax.random.normal(kx, (2, latent_channels, 16, 16), dtype=jnp.float32)
    ref = jax.block_until_ready(reference_forward(x, params))
    assert ref.shape == (2, inter_channels, 4, 4), ref.shape

    # f32 build: strict numerical check of the kernel structure.
    fwd_f32 = jax.jit(build_hyperprior_analysis(params, in_hw=(16, 16),
                                                compute_dtype=jnp.float32))
    out32 = jax.block_until_ready(fwd_f32(x))
    assert out32.shape == ref.shape, out32.shape
    np.testing.assert_allclose(np.asarray(out32), np.asarray(ref),
                               rtol=2e-4, atol=2e-4)

    # bf16 build (default): MXU-throughput path, f32 accumulation.
    fwd_bf16 = jax.jit(build_hyperprior_analysis(params, in_hw=(16, 16)))
    out16 = jax.block_until_ready(fwd_bf16(x))
    assert out16.shape == ref.shape, out16.shape
    np.testing.assert_allclose(np.asarray(out16), np.asarray(ref),
                               rtol=5e-2, atol=5e-2)

    print("KERNEL_OK")
</pallas_src>

<mosaic_0001>
module attributes {stable_mosaic.version = 11 : i64} {
  func.func @_fused_kernel(%arg0: i32, %arg1: memref<1x324x8xf32, #tpu.memory_space<vmem>>, %arg2: memref<9x8x8xf32, #tpu.memory_space<vmem>>, %arg3: memref<1x8xf32, #tpu.memory_space<vmem>>, %arg4: memref<25x8x8xf32, #tpu.memory_space<vmem>>, %arg5: memref<1x8xf32, #tpu.memory_space<vmem>>, %arg6: memref<25x8x8xf32, #tpu.memory_space<vmem>>, %arg7: memref<1x16x8xf32, #tpu.memory_space<vmem>>, %arg8: memref<400x8xf32, #tpu.memory_space<vmem>>, %arg9: memref<144x8xf32, #tpu.memory_space<vmem>>) attributes {dimension_semantics = [#tpu.dimension_semantics<parallel>], iteration_bounds = array<i64: 2>, scalar_prefetch = 0 : i64, scratch_operands = 2 : i64, tpu.core_type = #tpu.core_type<tc>, window_params = [{transform_indices = @transform_0, window_bounds = array<i64: 1, 324, 8>}, {pipeline_mode = #tpu.pipeline_mode<synchronous>, transform_indices = @transform_1, window_bounds = array<i64: 9, 8, 8>}, {pipeline_mode = #tpu.pipeline_mode<synchronous>, transform_indices = @transform_2, window_bounds = array<i64: 1, 8>}, {pipeline_mode = #tpu.pipeline_mode<synchronous>, transform_indices = @transform_3, window_bounds = array<i64: 25, 8, 8>}, {pipeline_mode = #tpu.pipeline_mode<synchronous>, transform_indices = @transform_4, window_bounds = array<i64: 1, 8>}, {pipeline_mode = #tpu.pipeline_mode<synchronous>, transform_indices = @transform_5, window_bounds = array<i64: 25, 8, 8>}, {transform_indices = @transform_6, window_bounds = array<i64: 1, 16, 8>}]} {
    %cst = arith.constant 0.000000e+00 : f32
    %0 = vector.broadcast %cst : f32 to vector<400x8xf32>
    %c0 = arith.constant 0 : index
    %c0_0 = arith.constant 0 : index
    %1 = vector.load %arg8[%c0, %c0_0] : memref<400x8xf32, #tpu.memory_space<vmem>>, vector<400x8xf32>
    tpu.vector_store %arg8[%c0, %c0_0], %0 {strides = array<i32>} : memref<400x8xf32, #tpu.memory_space<vmem>>, vector<400x8xf32>,
    %c0_i32 = arith.constant 0 : i32
    %c16_i32 = arith.constant 16 : i32
    %2 = arith.addi %c0_i32, %c16_i32 : i32
    %c1_i32 = arith.constant 1 : i32
    scf.for %arg10 = %c0_i32 to %2 step %c1_i32  : i32 {
      %cst_11 = arith.constant 0.000000e+00 : f32
      %7 = vector.broadcast %cst_11 : f32 to vector<16x8xf32>
      %c1_i32_12 = arith.constant 1 : i32
      %8 = arith.muli %arg10, %c1_i32_12 : i32
      %c0_i32_13 = arith.constant 0 : i32
      %9 = arith.addi %8, %c0_i32_13 : i32
      %c18_i32 = arith.constant 18 : i32
      %10 = arith.muli %9, %c18_i32 : i32
      %c0_i32_14 = arith.constant 0 : i32
      %11 = arith.addi %10, %c0_i32_14 : i32
      %c0_15 = arith.constant 0 : index
      %12 = arith.index_cast %11 : i32 to index
      %c0_16 = arith.constant 0 : index
      %13 = vector.load %arg1[%c0_15, %12, %c0_16] : memref<1x324x8xf32, #tpu.memory_space<vmem>>, vector<1x16x8xf32>
      %14 = vector.shape_cast %13 : vector<1x16x8xf32> to vector<16x8xf32>
      %c0_17 = arith.constant 0 : index
      %c0_18 = arith.constant 0 : index
      %c0_19 = arith.constant 0 : index
      %15 = vector.load %arg2[%c0_17, %c0_18, %c0_19] : memref<9x8x8xf32, #tpu.memory_space<vmem>>, vector<1x8x8xf32>
      %16 = vector.shape_cast %15 : vector<1x8x8xf32> to vector<8x8xf32>
      %cst_20 = arith.constant dense<0.000000e+00> : vector<16x8xf32>
      %17 = tpu.matmul %14, %16, %cst_20 {dimension_numbers = #tpu.dot_dimension_numbers<[1], [0], [0], [1], [0, 0, 1, 1], [], []>} : vector<16x8xf32>, vector<8x8xf32>, vector<16x8xf32> -> vector<16x8xf32>
      %18 = arith.addf %7, %17 : vector<16x8xf32>
      %c1_i32_21 = arith.constant 1 : i32
      %19 = arith.addi %10, %c1_i32_21 : i32
      %c0_22 = arith.constant 0 : index
      %20 = arith.index_cast %19 : i32 to index
      %c0_23 = arith.constant 0 : index
      %21 = vector.load %arg1[%c0_22, %20, %c0_23] : memref<1x324x8xf32, #tpu.memory_space<vmem>>, vector<1x16x8xf32>
      %22 = vector.shape_cast %21 : vector<1x16x8xf32> to vector<16x8xf32>
      %c1 = arith.constant 1 : index
      %c0_24 = arith.constant 0 : index
      %c0_25 = arith.constant 0 : index
      %23 = vector.load %arg2[%c1, %c0_24, %c0_25] : memref<9x8x8xf32, #tpu.memory_space<vmem>>, vector<1x8x8xf32>
      %24 = vector.shape_cast %23 : vector<1x8x8xf32> to vector<8x8xf32>
      %cst_26 = arith.constant dense<0.000000e+00> : vector<16x8xf32>
      %25 = tpu.matmul %22, %24, %cst_26 {dimension_numbers = #tpu.dot_dimension_numbers<[1], [0], [0], [1], [0, 0, 1, 1], [], []>} : vector<16x8xf32>, vector<8x8xf32>, vector<16x8xf32> -> vector<16x8xf32>
      %26 = arith.addf %18, %25 : vector<16x8xf32>
      %c2_i32 = arith.constant 2 : i32
      %27 = arith.addi %10, %c2_i32 : i32
      %c0_27 = arith.constant 0 : index
      %28 = arith.index_cast %27 : i32 to index
      %c0_28 = arith.constant 0 : index
      %29 = vector.load %arg1[%c0_27, %28, %c0_28] : memref<1x324x8xf32, #tpu.memory_space<vmem>>, vector<1x16x8xf32>
      %30 = vector.shape_cast %29 : vector<1x16x8xf32> to vector<16x8xf32>
      %c2 = arith.constant 2 : index
      %c0_29 = arith.constant 0 : index
      %c0_30 = arith.constant 0 : index
      %31 = vector.load %arg2[%c2, %c0_29, %c0_30] : memref<9x8x8xf32, #tpu.memory_space<vmem>>, vector<1x8x8xf32>
      %32 = vector.shape_cast %31 : vector<1x8x8xf32> to vector<8x8xf32>
      %cst_31 = arith.constant dense<0.000000e+00> : vector<16x8xf32>
      %33 = tpu.matmul %30, %32, %cst_31 {dimension_numbers = #tpu.dot_dimension_numbers<[1], [0], [0], [1], [0, 0, 1, 1], [], []>} : vector<16x8xf32>, vector<8x8xf32>, vector<16x8xf32> -> vector<16x8xf32>
      %34 = arith.addf %26, %33 : vector<16x8xf32>
      %c1_i32_32 = arith.constant 1 : i32
      %35 = arith.muli %arg10, %c1_i32_32 : i32
      %c1_i32_33 = arith.constant 1 : i32
      %36 = arith.addi %35, %c1_i32_33 : i32
      %c18_i32_34 = arith.constant 18 : i32
      %37 = arith.muli %36, %c18_i32_34 : i32
      %c0_i32_35 = arith.constant 0 : i32
      %38 = arith.addi %37, %c0_i32_35 : i32
      %c0_36 = arith.constant 0 : index
      %39 = arith.index_cast %38 : i32 to index
      %c0_37 = arith.constant 0 : index
      %40 = vector.load %arg1[%c0_36, %39, %c0_37] : memref<1x324x8xf32, #tpu.memory_space<vmem>>, vector<1x16x8xf32>
      %41 = vector.shape_cast %40 : vector<1x16x8xf32> to vector<16x8xf32>
      %c3 = arith.constant 3 : index
      %c0_38 = arith.constant 0 : index
      %c0_39 = arith.constant 0 : index
      %42 = vector.load %arg2[%c3, %c0_38, %c0_39] : memref<9x8x8xf32, #tpu.memory_space<vmem>>, vector<1x8x8xf32>
      %43 = vector.shape_cast %42 : vector<1x8x8xf32> to vector<8x8xf32>
      %cst_40 = arith.constant dense<0.000000e+00> : vector<16x8xf32>
      %44 = tpu.matmul %41, %43, %cst_40 {dimension_numbers = #tpu.dot_dimension_numbers<[1], [0], [0], [1], [0, 0, 1, 1], [], []>} : vector<16x8xf32>, vector<8x8xf32>, vector<16x8xf32> -> vector<16x8xf32>
      %45 = arith.addf %34, %44 : vector<16x8xf32>
      %c1_i32_41 = arith.constant 1 : i32
      %46 = arith.addi %37, %c1_i32_41 : i32
      %c0_42 = arith.constant 0 : index
      %47 = arith.index_cast %46 : i32 to index
      %c0_43 = arith.constant 0 : index
      %48 = vector.load %arg1[%c0_42, %47, %c0_43] : memref<1x324x8xf32, #tpu.memory_space<vmem>>, vector<1x16x8xf32>
      %49 = vector.shape_cast %48 : vector<1x16x8xf32> to vector<16x8xf32>
      %c4 = arith.constant 4 : index
      %c0_44 = arith.constant 0 : index
      %c0_45 = arith.constant 0 : index
      %50 = vector.load %arg2[%c4, %c0_44, %c0_45] : memref<9x8x8xf32, #tpu.memory_space<vmem>>, vector<1x8x8xf32>
      %51 = vector.shape_cast %50 : vector<1x8x8xf32> to vector<8x8xf32>
      %cst_46 = arith.constant dense<0.000000e+00> : vector<16x8xf32>
      %52 = tpu.matmul %49, %51, %cst_46 {dimension_numbers = #tpu.dot_dimension_numbers<[1], [0], [0], [1], [0, 0, 1, 1], [], []>} : vector<16x8xf32>, vector<8x8xf32>, vector<16x8xf32> -> vector<16x8xf32>
      %53 = arith.addf %45, %52 : vector<16x8xf32>
      %c2_i32_47 = arith.constant 2 : i32
      %54 = arith.addi %37, %c2_i32_47 : i32
      %c0_48 = arith.constant 0 : index
      %55 = arith.index_cast %54 : i32 to index
      %c0_49 = arith.constant 0 : index
      %56 = vector.load %arg1[%c0_48, %55, %c0_49] : memref<1x324x8xf32, #tpu.memory_space<vmem>>, vector<1x16x8xf32>
      %57 = vector.shape_cast %56 : vector<1x16x8xf32> to vector<16x8xf32>
      %c5 = arith.constant 5 : index
      %c0_50 = arith.constant 0 : index
      %c0_51 = arith.constant 0 : index
      %58 = vector.load %arg2[%c5, %c0_50, %c0_51] : memref<9x8x8xf32, #tpu.memory_space<vmem>>, vector<1x8x8xf32>
      %59 = vector.shape_cast %58 : vector<1x8x8xf32> to vector<8x8xf32>
      %cst_52 = arith.constant dense<0.000000e+00> : vector<16x8xf32>
      %60 = tpu.matmul %57, %59, %cst_52 {dimension_numbers = #tpu.dot_dimension_numbers<[1], [0], [0], [1], [0, 0, 1, 1], [], []>} : vector<16x8xf32>, vector<8x8xf32>, vector<16x8xf32> -> vector<16x8xf32>
      %61 = arith.addf %53, %60 : vector<16x8xf32>
      %c1_i32_53 = arith.constant 1 : i32
      %62 = arith.muli %arg10, %c1_i32_53 : i32
      %c2_i32_54 = arith.constant 2 : i32
      %63 = arith.addi %62, %c2_i32_54 : i32
      %c18_i32_55 = arith.constant 18 : i32
      %64 = arith.muli %63, %c18_i32_55 : i32
      %c0_i32_56 = arith.constant 0 : i32
      %65 = arith.addi %64, %c0_i32_56 : i32
      %c0_57 = arith.constant 0 : index
      %66 = arith.index_cast %65 : i32 to index
      %c0_58 = arith.constant 0 : index
      %67 = vector.load %arg1[%c0_57, %66, %c0_58] : memref<1x324x8xf32, #tpu.memory_space<vmem>>, vector<1x16x8xf32>
      %68 = vector.shape_cast %67 : vector<1x16x8xf32> to vector<16x8xf32>
      %c6 = arith.constant 6 : index
      %c0_59 = arith.constant 0 : index
      %c0_60 = arith.constant 0 : index
      %69 = vector.load %arg2[%c6, %c0_59, %c0_60] : memref<9x8x8xf32, #tpu.memory_space<vmem>>, vector<1x8x8xf32>
      %70 = vector.shape_cast %69 : vector<1x8x8xf32> to vector<8x8xf32>
      %cst_61 = arith.constant dense<0.000000e+00> : vector<16x8xf32>
      %71 = tpu.matmul %68, %70, %cst_61 {dimension_numbers = #tpu.dot_dimension_numbers<[1], [0], [0], [1], [0, 0, 1, 1], [], []>} : vector<16x8xf32>, vector<8x8xf32>, vector<16x8xf32> -> vector<16x8xf32>
      %72 = arith.addf %61, %71 : vector<16x8xf32>
      %c1_i32_62 = arith.constant 1 : i32
      %73 = arith.addi %64, %c1_i32_62 : i32
      %c0_63 = arith.constant 0 : index
      %74 = arith.index_cast %73 : i32 to index
      %c0_64 = arith.constant 0 : index
      %75 = vector.load %arg1[%c0_63, %74, %c0_64] : memref<1x324x8xf32, #tpu.memory_space<vmem>>, vector<1x16x8xf32>
      %76 = vector.shape_cast %75 : vector<1x16x8xf32> to vector<16x8xf32>
      %c7 = arith.constant 7 : index
      %c0_65 = arith.constant 0 : index
      %c0_66 = arith.constant 0 : index
      %77 = vector.load %arg2[%c7, %c0_65, %c0_66] : memref<9x8x8xf32, #tpu.memory_space<vmem>>, vector<1x8x8xf32>
      %78 = vector.shape_cast %77 : vector<1x8x8xf32> to vector<8x8xf32>
      %cst_67 = arith.constant dense<0.000000e+00> : vector<16x8xf32>
      %79 = tpu.matmul %76, %78, %cst_67 {dimension_numbers = #tpu.dot_dimension_numbers<[1], [0], [0], [1], [0, 0, 1, 1], [], []>} : vector<16x8xf32>, vector<8x8xf32>, vector<16x8xf32> -> vector<16x8xf32>
      %80 = arith.addf %72, %79 : vector<16x8xf32>
      %c2_i32_68 = arith.constant 2 : i32
      %81 = arith.addi %64, %c2_i32_68 : i32
      %c0_69 = arith.constant 0 : index
      %82 = arith.index_cast %81 : i32 to index
      %c0_70 = arith.constant 0 : index
      %83 = vector.load %arg1[%c0_69, %82, %c0_70] : memref<1x324x8xf32, #tpu.memory_space<vmem>>, vector<1x16x8xf32>
      %84 = vector.shape_cast %83 : vector<1x16x8xf32> to vector<16x8xf32>
      %c8 = arith.constant 8 : index
      %c0_71 = arith.constant 0 : index
      %c0_72 = arith.constant 0 : index
      %85 = vector.load %arg2[%c8, %c0_71, %c0_72] : memref<9x8x8xf32, #tpu.memory_space<vmem>>, vector<1x8x8xf32>
      %86 = vector.shape_cast %85 : vector<1x8x8xf32> to vector<8x8xf32>
      %cst_73 = arith.constant dense<0.000000e+00> : vector<16x8xf32>
      %87 = tpu.matmul %84, %86, %cst_73 {dimension_numbers = #tpu.dot_dimension_numbers<[1], [0], [0], [1], [0, 0, 1, 1], [], []>} : vector<16x8xf32>, vector<8x8xf32>, vector<16x8xf32> -> vector<16x8xf32>
      %88 = arith.addf %80, %87 : vector<16x8xf32>
      %c0_74 = arith.constant 0 : index
      %c0_75 = arith.constant 0 : index
      %89 = vector.load %arg3[%c0_74, %c0_75] : memref<1x8xf32, #tpu.memory_space<vmem>>, vector<1x8xf32>
      %90 = vector.broadcast %89 : vector<1x8xf32> to vector<16x8xf32>
      %91 = arith.addf %88, %90 : vector<16x8xf32>
      %cst_76 = arith.constant 0.000000e+00 : f32
      %92 = vector.broadcast %cst_76 : f32 to vector<16x8xf32>
      %93 = arith.maximumf %91, %92 : vector<16x8xf32>
      %c2_i32_77 = arith.constant 2 : i32
      %94 = arith.addi %arg10, %c2_i32_77 : i32
      %c20_i32 = arith.constant 20 : i32
      %95 = arith.muli %94, %c20_i32 : i32
      %c2_i32_78 = arith.constant 2 : i32
      %96 = arith.addi %95, %c2_i32_78 : i32
      %97 = arith.index_cast %96 : i32 to index
      %c0_79 = arith.constant 0 : index
      %98 = vector.load %arg8[%97, %c0_79] : memref<400x8xf32, #tpu.memory_space<vmem>>, vector<16x8xf32>
      tpu.vector_store %arg8[%97, %c0_79], %93 {strides = array<i32>} : memref<400x8xf32, #tpu.memory_space<vmem>>, vector<16x8xf32>,
    }
    %c16_i32_1 = arith.constant 16 : i32
    %cst_2 = arith.constant 0.000000e+00 : f32
    %3 = vector.broadcast %cst_2 : f32 to vector<144x8xf32>
    %c0_3 = arith.constant 0 : index
    %c0_4 = arith.constant 0 : index
    %4 = vector.load %arg9[%c0_3, %c0_4] : memref<144x8xf32, #tpu.memory_space<vmem>>, vector<144x8xf32>
    tpu.vector_store %arg9[%c0_3, %c0_4], %3 {strides = array<i32>} : memref<144x8xf32, #tpu.memory_space<vmem>>, vector<144x8xf32>,
    %c0_i32_5 = arith.constant 0 : i32
    %c8_i32 = arith.constant 8 : i32
    %5 = arith.addi %c0_i32_5, %c8_i32 : i32
    %c1_i32_6 = arith.constant 1 : i32
    scf.for %arg10 = %c0_i32_5 to %5 step %c1_i32_6  : i32 {
      %cst_11 = arith.constant 0.000000e+00 : f32
      %7 = vector.broadcast %cst_11 : f32 to vector<8x8xf32>
      %c2_i32 = arith.constant 2 : i32
      %8 = arith.muli %arg10, %c2_i32 : i32
      %c0_i32_12 = arith.constant 0 : i32
      %9 = arith.addi %8, %c0_i32_12 : i32
      %c20_i32 = arith.constant 20 : i32
      %10 = arith.muli %9, %c20_i32 : i32
      %c0_i32_13 = arith.constant 0 : i32
      %11 = arith.addi %10, %c0_i32_13 : i32
      %12 = arith.index_cast %11 : i32 to index
      %c0_14 = arith.constant 0 : index
      %13 = tpu.strided_load %arg8[%12, %c0_14] {strides = array<i32: 2, 1>} : memref<400x8xf32, #tpu.memory_space<vmem>>, vector<8x8xf32>
      %c0_15 = arith.constant 0 : index
      %c0_16 = arith.constant 0 : index
      %c0_17 = arith.constant 0 : index
      %14 = vector.load %arg4[%c0_15, %c0_16, %c0_17] : memref<25x8x8xf32, #tpu.memory_space<vmem>>, vector<1x8x8xf32>
      %15 = vector.shape_cast %14 : vector<1x8x8xf32> to vector<8x8xf32>
      %cst_18 = arith.constant dense<0.000000e+00> : vector<8x8xf32>
      %16 = tpu.matmul %13, %15, %cst_18 {dimension_numbers = #tpu.dot_dimension_numbers<[1], [0], [0], [1], [0, 0, 1, 1], [], []>} : vector<8x8xf32>, vector<8x8xf32>, vector<8x8xf32> -> vector<8x8xf32>
      %17 = arith.addf %7, %16 : vector<8x8xf32>
      %c1_i32_19 = arith.constant 1 : i32
      %18 = arith.addi %10, %c1_i32_19 : i32
      %19 = arith.index_cast %18 : i32 to index
      %c0_20 = arith.constant 0 : index
      %20 = tpu.strided_load %arg8[%19, %c0_20] {strides = array<i32: 2, 1>} : memref<400x8xf32, #tpu.memory_space<vmem>>, vector<8x8xf32>
      %c1 = arith.constant 1 : index
      %c0_21 = arith.constant 0 : index
      %c0_22 = arith.constant 0 : index
      %21 = vector.load %arg4[%c1, %c0_21, %c0_22] : memref<25x8x8xf32, #tpu.memory_space<vmem>>, vector<1x8x8xf32>
      %22 = vector.shape_cast %21 : vector<1x8x8xf32> to vector<8x8xf32>
      %cst_23 = arith.constant dense<0.000000e+00> : vector<8x8xf32>
      %23 = tpu.matmul %20, %22, %cst_23 {dimension_numbers = #tpu.dot_dimension_numbers<[1], [0], [0], [1], [0, 0, 1, 1], [], []>} : vector<8x8xf32>, vector<8x8xf32>, vector<8x8xf32> -> vector<8x8xf32>
      %24 = arith.addf %17, %23 : vector<8x8xf32>
      %c2_i32_24 = arith.constant 2 : i32
      %25 = arith.addi %10, %c2_i32_24 : i32
      %26 = arith.index_cast %25 : i32 to index
      %c0_25 = arith.constant 0 : index
      %27 = tpu.strided_load %arg8[%26, %c0_25] {strides = array<i32: 2, 1>} : memref<400x8xf32, #tpu.memory_space<vmem>>, vector<8x8xf32>
      %c2 = arith.constant 2 : index
      %c0_26 = arith.constant 0 : index
      %c0_27 = arith.constant 0 : index
      %28 = vector.load %arg4[%c2, %c0_26, %c0_27] : memref<25x8x8xf32, #tpu.memory_space<vmem>>, vector<1x8x8xf32>
      %29 = vector.shape_cast %28 : vector<1x8x8xf32> to vector<8x8xf32>
      %cst_28 = arith.constant dense<0.000000e+00> : vector<8x8xf32>
      %30 = tpu.matmul %27, %29, %cst_28 {dimension_numbers = #tpu.dot_dimension_numbers<[1], [0], [0], [1], [0, 0, 1, 1], [], []>} : vector<8x8xf32>, vector<8x8xf32>, vector<8x8xf32> -> vector<8x8xf32>
      %31 = arith.addf %24, %30 : vector<8x8xf32>
      %c3_i32 = arith.constant 3 : i32
      %32 = arith.addi %10, %c3_i32 : i32
      %33 = arith.index_cast %32 : i32 to index
      %c0_29 = arith.constant 0 : index
      %34 = tpu.strided_load %arg8[%33, %c0_29] {strides = array<i32: 2, 1>} : memref<400x8xf32, #tpu.memory_space<vmem>>, vector<8x8xf32>
      %c3 = arith.constant 3 : index
      %c0_30 = arith.constant 0 : index
      %c0_31 = arith.constant 0 : index
      %35 = vector.load %arg4[%c3, %c0_30, %c0_31] : memref<25x8x8xf32, #tpu.memory_space<vmem>>, vector<1x8x8xf32>
      %36 = vector.shape_cast %35 : vector<1x8x8xf32> to vector<8x8xf32>
      %cst_32 = arith.constant dense<0.000000e+00> : vector<8x8xf32>
      %37 = tpu.matmul %34, %36, %cst_32 {dimension_numbers = #tpu.dot_dimension_numbers<[1], [0], [0], [1], [0, 0, 1, 1], [], []>} : vector<8x8xf32>, vector<8x8xf32>, vector<8x8xf32> -> vector<8x8xf32>
      %38 = arith.addf %31, %37 : vector<8x8xf32>
      %c4_i32_33 = arith.constant 4 : i32
      %39 = arith.addi %10, %c4_i32_33 : i32
      %40 = arith.index_cast %39 : i32 to index
      %c0_34 = arith.constant 0 : index
      %41 = tpu.strided_load %arg8[%40, %c0_34] {strides = array<i32: 2, 1>} : memref<400x8xf32, #tpu.memory_space<vmem>>, vector<8x8xf32>
      %c4 = arith.constant 4 : index
      %c0_35 = arith.constant 0 : index
      %c0_36 = arith.constant 0 : index
      %42 = vector.load %arg4[%c4, %c0_35, %c0_36] : memref<25x8x8xf32, #tpu.memory_space<vmem>>, vector<1x8x8xf32>
      %43 = vector.shape_cast %42 : vector<1x8x8xf32> to vector<8x8xf32>
      %cst_37 = arith.constant dense<0.000000e+00> : vector<8x8xf32>
      %44 = tpu.matmul %41, %43, %cst_37 {dimension_numbers = #tpu.dot_dimension_numbers<[1], [0], [0], [1], [0, 0, 1, 1], [], []>} : vector<8x8xf32>, vector<8x8xf32>, vector<8x8xf32> -> vector<8x8xf32>
      %45 = arith.addf %38, %44 : vector<8x8xf32>
      %c2_i32_38 = arith.constant 2 : i32
      %46 = arith.muli %arg10, %c2_i32_38 : i32
      %c1_i32_39 = arith.constant 1 : i32
      %47 = arith.addi %46, %c1_i32_39 : i32
      %c20_i32_40 = arith.constant 20 : i32
      %48 = arith.muli %47, %c20_i32_40 : i32
      %c0_i32_41 = arith.constant 0 : i32
      %49 = arith.addi %48, %c0_i32_41 : i32
      %50 = arith.index_cast %49 : i32 to index
      %c0_42 = arith.constant 0 : index
      %51 = tpu.strided_load %arg8[%50, %c0_42] {strides = array<i32: 2, 1>} : memref<400x8xf32, #tpu.memory_space<vmem>>, vector<8x8xf32>
      %c5 = arith.constant 5 : index
      %c0_43 = arith.constant 0 : index
      %c0_44 = arith.constant 0 : index
      %52 = vector.load %arg4[%c5, %c0_43, %c0_44] : memref<25x8x8xf32, #tpu.memory_space<vmem>>, vector<1x8x8xf32>
      %53 = vector.shape_cast %52 : vector<1x8x8xf32> to vector<8x8xf32>
      %cst_45 = arith.constant dense<0.000000e+00> : vector<8x8xf32>
      %54 = tpu.matmul %51, %53, %cst_45 {dimension_numbers = #tpu.dot_dimension_numbers<[1], [0], [0], [1], [0, 0, 1, 1], [], []>} : vector<8x8xf32>, vector<8x8xf32>, vector<8x8xf32> -> vector<8x8xf32>
      %55 = arith.addf %45, %54 : vector<8x8xf32>
      %c1_i32_46 = arith.constant 1 : i32
      %56 = arith.addi %48, %c1_i32_46 : i32
      %57 = arith.index_cast %56 : i32 to index
      %c0_47 = arith.constant 0 : index
      %58 = tpu.strided_load %arg8[%57, %c0_47] {strides = array<i32: 2, 1>} : memref<400x8xf32, #tpu.memory_space<vmem>>, vector<8x8xf32>
      %c6 = arith.constant 6 : index
      %c0_48 = arith.constant 0 : index
      %c0_49 = arith.constant 0 : index
      %59 = vector.load %arg4[%c6, %c0_48, %c0_49] : memref<25x8x8xf32, #tpu.memory_space<vmem>>, vector<1x8x8xf32>
      %60 = vector.shape_cast %59 : vector<1x8x8xf32> to vector<8x8xf32>
      %cst_50 = arith.constant dense<0.000000e+00> : vector<8x8xf32>
      %61 = tpu.matmul %58, %60, %cst_50 {dimension_numbers = #tpu.dot_dimension_numbers<[1], [0], [0], [1], [0, 0, 1, 1], [], []>} : vector<8x8xf32>, vector<8x8xf32>, vector<8x8xf32> -> vector<8x8xf32>
      %62 = arith.addf %55, %61 : vector<8x8xf32>
      %c2_i32_51 = arith.constant 2 : i32
      %63 = arith.addi %48, %c2_i32_51 : i32
      %64 = arith.index_cast %63 : i32 to index
      %c0_52 = arith.constant 0 : index
      %65 = tpu.strided_load %arg8[%64, %c0_52] {strides = array<i32: 2, 1>} : memref<400x8xf32, #tpu.memory_space<vmem>>, vector<8x8xf32>
      %c7 = arith.constant 7 : index
      %c0_53 = arith.constant 0 : index
      %c0_54 = arith.constant 0 : index
      %66 = vector.load %arg4[%c7, %c0_53, %c0_54] : memref<25x8x8xf32, #tpu.memory_space<vmem>>, vector<1x8x8xf32>
      %67 = vector.shape_cast %66 : vector<1x8x8xf32> to vector<8x8xf32>
      %cst_55 = arith.constant dense<0.000000e+00> : vector<8x8xf32>
      %68 = tpu.matmul %65, %67, %cst_55 {dimension_numbers = #tpu.dot_dimension_numbers<[1], [0], [0], [1], [0, 0, 1, 1], [], []>} : vector<8x8xf32>, vector<8x8xf32>, vector<8x8xf32> -> vector<8x8xf32>
      %69 = arith.addf %62, %68 : vector<8x8xf32>
      %c3_i32_56 = arith.constant 3 : i32
      %70 = arith.addi %48, %c3_i32_56 : i32
      %71 = arith.index_cast %70 : i32 to index
      %c0_57 = arith.constant 0 : index
      %72 = tpu.strided_load %arg8[%71, %c0_57] {strides = array<i32: 2, 1>} : memref<400x8xf32, #tpu.memory_space<vmem>>, vector<8x8xf32>
      %c8 = arith.constant 8 : index
      %c0_58 = arith.constant 0 : index
      %c0_59 = arith.constant 0 : index
      %73 = vector.load %arg4[%c8, %c0_58, %c0_59] : memref<25x8x8xf32, #tpu.memory_space<vmem>>, vector<1x8x8xf32>
      %74 = vector.shape_cast %73 : vector<1x8x8xf32> to vector<8x8xf32>
      %cst_60 = arith.constant dense<0.000000e+00> : vector<8x8xf32>
      %75 = tpu.matmul %72, %74, %cst_60 {dimension_numbers = #tpu.dot_dimension_numbers<[1], [0], [0], [1], [0, 0, 1, 1], [], []>} : vector<8x8xf32>, vector<8x8xf32>, vector<8x8xf32> -> vector<8x8xf32>
      %76 = arith.addf %69, %75 : vector<8x8xf32>
      %c4_i32_61 = arith.constant 4 : i32
      %77 = arith.addi %48, %c4_i32_61 : i32
      %78 = arith.index_cast %77 : i32 to index
      %c0_62 = arith.constant 0 : index
      %79 = tpu.strided_load %arg8[%78, %c0_62] {strides = array<i32: 2, 1>} : memref<400x8xf32, #tpu.memory_space<vmem>>, vector<8x8xf32>
      %c9 = arith.constant 9 : index
      %c0_63 = arith.constant 0 : index
      %c0_64 = arith.constant 0 : index
      %80 = vector.load %arg4[%c9, %c0_63, %c0_64] : memref<25x8x8xf32, #tpu.memory_space<vmem>>, vector<1x8x8xf32>
      %81 = vector.shape_cast %80 : vector<1x8x8xf32> to vector<8x8xf32>
      %cst_65 = arith.constant dense<0.000000e+00> : vector<8x8xf32>
      %82 = tpu.matmul %79, %81, %cst_65 {dimension_numbers = #tpu.dot_dimension_numbers<[1], [0], [0], [1], [0, 0, 1, 1], [], []>} : vector<8x8xf32>, vector<8x8xf32>, vector<8x8xf32> -> vector<8x8xf32>
      %83 = arith.addf %76, %82 : vector<8x8xf32>
      %c2_i32_66 = arith.constant 2 : i32
      %84 = arith.muli %arg10, %c2_i32_66 : i32
      %c2_i32_67 = arith.constant 2 : i32
      %85 = arith.addi %84, %c2_i32_67 : i32
      %c20_i32_68 = arith.constant 20 : i32
      %86 = arith.muli %85, %c20_i32_68 : i32
      %c0_i32_69 = arith.constant 0 : i32
      %87 = arith.addi %86, %c0_i32_69 : i32
      %88 = arith.index_cast %87 : i32 to index
      %c0_70 = arith.constant 0 : index
      %89 = tpu.strided_load %arg8[%88, %c0_70] {strides = array<i32: 2, 1>} : memref<400x8xf32, #tpu.memory_space<vmem>>, vector<8x8xf32>
      %c10 = arith.constant 10 : index
      %c0_71 = arith.constant 0 : index
      %c0_72 = arith.constant 0 : index
      %90 = vector.load %arg4[%c10, %c0_71, %c0_72] : memref<25x8x8xf32, #tpu.memory_space<vmem>>, vector<1x8x8xf32>
      %91 = vector.shape_cast %90 : vector<1x8x8xf32> to vector<8x8xf32>
      %cst_73 = arith.constant dense<0.000000e+00> : vector<8x8xf32>
      %92 = tpu.matmul %89, %91, %cst_73 {dimension_numbers = #tpu.dot_dimension_numbers<[1], [0], [0], [1], [0, 0, 1, 1], [], []>} : vector<8x8xf32>, vector<8x8xf32>, vector<8x8xf32> -> vector<8x8xf32>
      %93 = arith.addf %83, %92 : vector<8x8xf32>
      %c1_i32_74 = arith.constant 1 : i32
      %94 = arith.addi %86, %c1_i32_74 : i32
      %95 = arith.index_cast %94 : i32 to index
      %c0_75 = arith.constant 0 : index
      %96 = tpu.strided_load %arg8[%95, %c0_75] {strides = array<i32: 2, 1>} : memref<400x8xf32, #tpu.memory_space<vmem>>, vector<8x8xf32>
      %c11 = arith.constant 11 : index
      %c0_76 = arith.constant 0 : index
      %c0_77 = arith.constant 0 : index
      %97 = vector.load %arg4[%c11, %c0_76, %c0_77] : memref<25x8x8xf32, #tpu.memory_space<vmem>>, vector<1x8x8xf32>
      %98 = vector.shape_cast %97 : vector<1x8x8xf32> to vector<8x8xf32>
      %cst_78 = arith.constant dense<0.000000e+00> : vector<8x8xf32>
      %99 = tpu.matmul %96, %98, %cst_78 {dimension_numbers = #tpu.dot_dimension_numbers<[1], [0], [0], [1], [0, 0, 1, 1], [], []>} : vector<8x8xf32>, vector<8x8xf32>, vector<8x8xf32> -> vector<8x8xf32>
      %100 = arith.addf %93, %99 : vector<8x8xf32>
      %c2_i32_79 = arith.constant 2 : i32
      %101 = arith.addi %86, %c2_i32_79 : i32
      %102 = arith.index_cast %101 : i32 to index
      %c0_80 = arith.constant 0 : index
      %103 = tpu.strided_load %arg8[%102, %c0_80] {strides = array<i32: 2, 1>} : memref<400x8xf32, #tpu.memory_space<vmem>>, vector<8x8xf32>
      %c12 = arith.constant 12 : index
      %c0_81 = arith.constant 0 : index
      %c0_82 = arith.constant 0 : index
      %104 = vector.load %arg4[%c12, %c0_81, %c0_82] : memref<25x8x8xf32, #tpu.memory_space<vmem>>, vector<1x8x8xf32>
      %105 = vector.shape_cast %104 : vector<1x8x8xf32> to vector<8x8xf32>
      %cst_83 = arith.constant dense<0.000000e+00> : vector<8x8xf32>
      %106 = tpu.matmul %103, %105, %cst_83 {dimension_numbers = #tpu.dot_dimension_numbers<[1], [0], [0], [1], [0, 0, 1, 1], [], []>} : vector<8x8xf32>, vector<8x8xf32>, vector<8x8xf32> -> vector<8x8xf32>
      %107 = arith.addf %100, %106 : vector<8x8xf32>
      %c3_i32_84 = arith.constant 3 : i32
      %108 = arith.addi %86, %c3_i32_84 : i32
      %109 = arith.index_cast %108 : i32 to index
      %c0_85 = arith.constant 0 : index
      %110 = tpu.strided_load %arg8[%109, %c0_85] {strides = array<i32: 2, 1>} : memref<400x8xf32, #tpu.memory_space<vmem>>, vector<8x8xf32>
      %c13 = arith.constant 13 : index
      %c0_86 = arith.constant 0 : index
      %c0_87 = arith.constant 0 : index
      %111 = vector.load %arg4[%c13, %c0_86, %c0_87] : memref<25x8x8xf32, #tpu.memory_space<vmem>>, vector<1x8x8xf32>
      %112 = vector.shape_cast %111 : vector<1x8x8xf32> to vector<8x8xf32>
      %cst_88 = arith.constant dense<0.000000e+00> : vector<8x8xf32>
      %113 = tpu.matmul %110, %112, %cst_88 {dimension_numbers = #tpu.dot_dimension_numbers<[1], [0], [0], [1], [0, 0, 1, 1], [], []>} : vector<8x8xf32>, vector<8x8xf32>, vector<8x8xf32> -> vector<8x8xf32>
      %114 = arith.addf %107, %113 : vector<8x8xf32>
      %c4_i32_89 = arith.constant 4 : i32
      %115 = arith.addi %86, %c4_i32_89 : i32
      %116 = arith.index_cast %115 : i32 to index
      %c0_90 = arith.constant 0 : index
      %117 = tpu.strided_load %arg8[%116, %c0_90] {strides = array<i32: 2, 1>} : memref<400x8xf32, #tpu.memory_space<vmem>>, vector<8x8xf32>
      %c14 = arith.constant 14 : index
      %c0_91 = arith.constant 0 : index
      %c0_92 = arith.constant 0 : index
      %118 = vector.load %arg4[%c14, %c0_91, %c0_92] : memref<25x8x8xf32, #tpu.memory_space<vmem>>, vector<1x8x8xf32>
      %119 = vector.shape_cast %118 : vector<1x8x8xf32> to vector<8x8xf32>
      %cst_93 = arith.constant dense<0.000000e+00> : vector<8x8xf32>
      %120 = tpu.matmul %117, %119, %cst_93 {dimension_numbers = #tpu.dot_dimension_numbers<[1], [0], [0], [1], [0, 0, 1, 1], [], []>} : vector<8x8xf32>, vector<8x8xf32>, vector<8x8xf32> -> vector<8x8xf32>
      %121 = arith.addf %114, %120 : vector<8x8xf32>
      %c2_i32_94 = arith.constant 2 : i32
      %122 = arith.muli %arg10, %c2_i32_94 : i32
      %c3_i32_95 = arith.constant 3 : i32
      %123 = arith.addi %122, %c3_i32_95 : i32
      %c20_i32_96 = arith.constant 20 : i32
      %124 = arith.muli %123, %c20_i32_96 : i32
      %c0_i32_97 = arith.constant 0 : i32
      %125 = arith.addi %124, %c0_i32_97 : i32
      %126 = arith.index_cast %125 : i32 to index
      %c0_98 = arith.constant 0 : index
      %127 = tpu.strided_load %arg8[%126, %c0_98] {strides = array<i32: 2, 1>} : memref<400x8xf32, #tpu.memory_space<vmem>>, vector<8x8xf32>
      %c15 = arith.constant 15 : index
      %c0_99 = arith.constant 0 : index
      %c0_100 = arith.constant 0 : index
      %128 = vector.load %arg4[%c15, %c0_99, %c0_100] : memref<25x8x8xf32, #tpu.memory_space<vmem>>, vector<1x8x8xf32>
      %129 = vector.shape_cast %128 : vector<1x8x8xf32> to vector<8x8xf32>
      %cst_101 = arith.constant dense<0.000000e+00> : vector<8x8xf32>
      %130 = tpu.matmul %127, %129, %cst_101 {dimension_numbers = #tpu.dot_dimension_numbers<[1], [0], [0], [1], [0, 0, 1, 1], [], []>} : vector<8x8xf32>, vector<8x8xf32>, vector<8x8xf32> -> vector<8x8xf32>
      %131 = arith.addf %121, %130 : vector<8x8xf32>
      %c1_i32_102 = arith.constant 1 : i32
      %132 = arith.addi %124, %c1_i32_102 : i32
      %133 = arith.index_cast %132 : i32 to index
      %c0_103 = arith.constant 0 : index
      %134 = tpu.strided_load %arg8[%133, %c0_103] {strides = array<i32: 2, 1>} : memref<400x8xf32, #tpu.memory_space<vmem>>, vector<8x8xf32>
      %c16 = arith.constant 16 : index
      %c0_104 = arith.constant 0 : index
      %c0_105 = arith.constant 0 : index
      %135 = vector.load %arg4[%c16, %c0_104, %c0_105] : memref<25x8x8xf32, #tpu.memory_space<vmem>>, vector<1x8x8xf32>
      %136 = vector.shape_cast %135 : vector<1x8x8xf32> to vector<8x8xf32>
      %cst_106 = arith.constant dense<0.000000e+00> : vector<8x8xf32>
      %137 = tpu.matmul %134, %136, %cst_106 {dimension_numbers = #tpu.dot_dimension_numbers<[1], [0], [0], [1], [0, 0, 1, 1], [], []>} : vector<8x8xf32>, vector<8x8xf32>, vector<8x8xf32> -> vector<8x8xf32>
      %138 = arith.addf %131, %137 : vector<8x8xf32>
      %c2_i32_107 = arith.constant 2 : i32
      %139 = arith.addi %124, %c2_i32_107 : i32
      %140 = arith.index_cast %139 : i32 to index
      %c0_108 = arith.constant 0 : index
      %141 = tpu.strided_load %arg8[%140, %c0_108] {strides = array<i32: 2, 1>} : memref<400x8xf32, #tpu.memory_space<vmem>>, vector<8x8xf32>
      %c17 = arith.constant 17 : index
      %c0_109 = arith.constant 0 : index
      %c0_110 = arith.constant 0 : index
      %142 = vector.load %arg4[%c17, %c0_109, %c0_110] : memref<25x8x8xf32, #tpu.memory_space<vmem>>, vector<1x8x8xf32>
      %143 = vector.shape_cast %142 : vector<1x8x8xf32> to vector<8x8xf32>
      %cst_111 = arith.constant dense<0.000000e+00> : vector<8x8xf32>
      %144 = tpu.matmul %141, %143, %cst_111 {dimension_numbers = #tpu.dot_dimension_numbers<[1], [0], [0], [1], [0, 0, 1, 1], [], []>} : vector<8x8xf32>, vector<8x8xf32>, vector<8x8xf32> -> vector<8x8xf32>
      %145 = arith.addf %138, %144 : vector<8x8xf32>
      %c3_i32_112 = arith.constant 3 : i32
      %146 = arith.addi %124, %c3_i32_112 : i32
      %147 = arith.index_cast %146 : i32 to index
      %c0_113 = arith.constant 0 : index
      %148 = tpu.strided_load %arg8[%147, %c0_113] {strides = array<i32: 2, 1>} : memref<400x8xf32, #tpu.memory_space<vmem>>, vector<8x8xf32>
      %c18 = arith.constant 18 : index
      %c0_114 = arith.constant 0 : index
      %c0_115 = arith.constant 0 : index
      %149 = vector.load %arg4[%c18, %c0_114, %c0_115] : memref<25x8x8xf32, #tpu.memory_space<vmem>>, vector<1x8x8xf32>
      %150 = vector.shape_cast %149 : vector<1x8x8xf32> to vector<8x8xf32>
      %cst_116 = arith.constant dense<0.000000e+00> : vector<8x8xf32>
      %151 = tpu.matmul %148, %150, %cst_116 {dimension_numbers = #tpu.dot_dimension_numbers<[1], [0], [0], [1], [0, 0, 1, 1], [], []>} : vector<8x8xf32>, vector<8x8xf32>, vector<8x8xf32> -> vector<8x8xf32>
      %152 = arith.addf %145, %151 : vector<8x8xf32>
      %c4_i32_117 = arith.constant 4 : i32
      %153 = arith.addi %124, %c4_i32_117 : i32
      %154 = arith.index_cast %153 : i32 to index
      %c0_118 = arith.constant 0 : index
      %155 = tpu.strided_load %arg8[%154, %c0_118] {strides = array<i32: 2, 1>} : memref<400x8xf32, #tpu.memory_space<vmem>>, vector<8x8xf32>
      %c19 = arith.constant 19 : index
      %c0_119 = arith.constant 0 : index
      %c0_120 = arith.constant 0 : index
      %156 = vector.load %arg4[%c19, %c0_119, %c0_120] : memref<25x8x8xf32, #tpu.memory_space<vmem>>, vector<1x8x8xf32>
      %157 = vector.shape_cast %156 : vector<1x8x8xf32> to vector<8x8xf32>
      %cst_121 = arith.constant dense<0.000000e+00> : vector<8x8xf32>
      %158 = tpu.matmul %155, %157, %cst_121 {dimension_numbers = #tpu.dot_dimension_numbers<[1], [0], [0], [1], [0, 0, 1, 1], [], []>} : vector<8x8xf32>, vector<8x8xf32>, vector<8x8xf32> -> vector<8x8xf32>
      %159 = arith.addf %152, %158 : vector<8x8xf32>
      %c2_i32_122 = arith.constant 2 : i32
      %160 = arith.muli %arg10, %c2_i32_122 : i32
      %c4_i32_123 = arith.constant 4 : i32
      %161 = arith.addi %160, %c4_i32_123 : i32
      %c20_i32_124 = arith.constant 20 : i32
      %162 = arith.muli %161, %c20_i32_124 : i32
      %c0_i32_125 = arith.constant 0 : i32
      %163 = arith.addi %162, %c0_i32_125 : i32
      %164 = arith.index_cast %163 : i32 to index
      %c0_126 = arith.constant 0 : index
      %165 = tpu.strided_load %arg8[%164, %c0_126] {strides = array<i32: 2, 1>} : memref<400x8xf32, #tpu.memory_space<vmem>>, vector<8x8xf32>
      %c20 = arith.constant 20 : index
      %c0_127 = arith.constant 0 : index
      %c0_128 = arith.constant 0 : index
      %166 = vector.load %arg4[%c20, %c0_127, %c0_128] : memref<25x8x8xf32, #tpu.memory_space<vmem>>, vector<1x8x8xf32>
      %167 = vector.shape_cast %166 : vector<1x8x8xf32> to vector<8x8xf32>
      %cst_129 = arith.constant dense<0.000000e+00> : vector<8x8xf32>
      %168 = tpu.matmul %165, %167, %cst_129 {dimension_numbers = #tpu.dot_dimension_numbers<[1], [0], [0], [1], [0, 0, 1, 1], [], []>} : vector<8x8xf32>, vector<8x8xf32>, vector<8x8xf32> -> vector<8x8xf32>
      %169 = arith.addf %159, %168 : vector<8x8xf32>
      %c1_i32_130 = arith.constant 1 : i32
      %170 = arith.addi %162, %c1_i32_130 : i32
      %171 = arith.index_cast %170 : i32 to index
      %c0_131 = arith.constant 0 : index
      %172 = tpu.strided_load %arg8[%171, %c0_131] {strides = array<i32: 2, 1>} : memref<400x8xf32, #tpu.memory_space<vmem>>, vector<8x8xf32>
      %c21 = arith.constant 21 : index
      %c0_132 = arith.constant 0 : index
      %c0_133 = arith.constant 0 : index
      %173 = vector.load %arg4[%c21, %c0_132, %c0_133] : memref<25x8x8xf32, #tpu.memory_space<vmem>>, vector<1x8x8xf32>
      %174 = vector.shape_cast %173 : vector<1x8x8xf32> to vector<8x8xf32>
      %cst_134 = arith.constant dense<0.000000e+00> : vector<8x8xf32>
      %175 = tpu.matmul %172, %174, %cst_134 {dimension_numbers = #tpu.dot_dimension_numbers<[1], [0], [0], [1], [0, 0, 1, 1], [], []>} : vector<8x8xf32>, vector<8x8xf32>, vector<8x8xf32> -> vector<8x8xf32>
      %176 = arith.addf %169, %175 : vector<8x8xf32>
      %c2_i32_135 = arith.constant 2 : i32
      %177 = arith.addi %162, %c2_i32_135 : i32
      %178 = arith.index_cast %177 : i32 to index
      %c0_136 = arith.constant 0 : index
      %179 = tpu.strided_load %arg8[%178, %c0_136] {strides = array<i32: 2, 1>} : memref<400x8xf32, #tpu.memory_space<vmem>>, vector<8x8xf32>
      %c22 = arith.constant 22 : index
      %c0_137 = arith.constant 0 : index
      %c0_138 = arith.constant 0 : index
      %180 = vector.load %arg4[%c22, %c0_137, %c0_138] : memref<25x8x8xf32, #tpu.memory_space<vmem>>, vector<1x8x8xf32>
      %181 = vector.shape_cast %180 : vector<1x8x8xf32> to vector<8x8xf32>
      %cst_139 = arith.constant dense<0.000000e+00> : vector<8x8xf32>
      %182 = tpu.matmul %179, %181, %cst_139 {dimension_numbers = #tpu.dot_dimension_numbers<[1], [0], [0], [1], [0, 0, 1, 1], [], []>} : vector<8x8xf32>, vector<8x8xf32>, vector<8x8xf32> -> vector<8x8xf32>
      %183 = arith.addf %176, %182 : vector<8x8xf32>
      %c3_i32_140 = arith.constant 3 : i32
      %184 = arith.addi %162, %c3_i32_140 : i32
      %185 = arith.index_cast %184 : i32 to index
      %c0_141 = arith.constant 0 : index
      %186 = tpu.strided_load %arg8[%185, %c0_141] {strides = array<i32: 2, 1>} : memref<400x8xf32, #tpu.memory_space<vmem>>, vector<8x8xf32>
      %c23 = arith.constant 23 : index
      %c0_142 = arith.constant 0 : index
      %c0_143 = arith.constant 0 : index
      %187 = vector.load %arg4[%c23, %c0_142, %c0_143] : memref<25x8x8xf32, #tpu.memory_space<vmem>>, vector<1x8x8xf32>
      %188 = vector.shape_cast %187 : vector<1x8x8xf32> to vector<8x8xf32>
      %cst_144 = arith.constant dense<0.000000e+00> : vector<8x8xf32>
      %189 = tpu.matmul %186, %188, %cst_144 {dimension_numbers = #tpu.dot_dimension_numbers<[1], [0], [0], [1], [0, 0, 1, 1], [], []>} : vector<8x8xf32>, vector<8x8xf32>, vector<8x8xf32> -> vector<8x8xf32>
      %190 = arith.addf %183, %189 : vector<8x8xf32>
      %c4_i32_145 = arith.constant 4 : i32
      %191 = arith.addi %162, %c4_i32_145 : i32
      %192 = arith.index_cast %191 : i32 to index
      %c0_146 = arith.constant 0 : index
      %193 = tpu.strided_load %arg8[%192, %c0_146] {strides = array<i32: 2, 1>} : memref<400x8xf32, #tpu.memory_space<vmem>>, vector<8x8xf32>
      %c24 = arith.constant 24 : index
      %c0_147 = arith.constant 0 : index
      %c0_148 = arith.constant 0 : index
      %194 = vector.load %arg4[%c24, %c0_147, %c0_148] : memref<25x8x8xf32, #tpu.memory_space<vmem>>, vector<1x8x8xf32>
      %195 = vector.shape_cast %194 : vector<1x8x8xf32> to vector<8x8xf32>
      %cst_149 = arith.constant dense<0.000000e+00> : vector<8x8xf32>
      %196 = tpu.matmul %193, %195, %cst_149 {dimension_numbers = #tpu.dot_dimension_numbers<[1], [0], [0], [1], [0, 0, 1, 1], [], []>} : vector<8x8xf32>, vector<8x8xf32>, vector<8x8xf32> -> vector<8x8xf32>
      %197 = arith.addf %190, %196 : vector<8x8xf32>
      %c0_150 = arith.constant 0 : index
      %c0_151 = arith.constant 0 : index
      %198 = vector.load %arg5[%c0_150, %c0_151] : memref<1x8xf32, #tpu.memory_space<vmem>>, vector<1x8xf32>
      %199 = vector.broadcast %198 : vector<1x8xf32> to vector<8x8xf32>
      %200 = arith.addf %197, %199 : vector<8x8xf32>
      %cst_152 = arith.constant 0.000000e+00 : f32
      %201 = vector.broadcast %cst_152 : f32 to vector<8x8xf32>
      %202 = arith.maximumf %200, %201 : vector<8x8xf32>
      %c2_i32_153 = arith.constant 2 : i32
      %203 = arith.addi %arg10, %c2_i32_153 : i32
      %c12_i32 = arith.constant 12 : i32
      %204 = arith.muli %203, %c12_i32 : i32
      %c2_i32_154 = arith.constant 2 : i32
      %205 = arith.addi %204, %c2_i32_154 : i32
      %206 = arith.index_cast %205 : i32 to index
      %c0_155 = arith.constant 0 : index
      %207 = vector.load %arg9[%206, %c0_155] : memref<144x8xf32, #tpu.memory_space<vmem>>, vector<8x8xf32>
      tpu.vector_store %arg9[%206, %c0_155], %202 {strides = array<i32>} : memref<144x8xf32, #tpu.memory_space<vmem>>, vector<8x8xf32>,
    }
    %c8_i32_7 = arith.constant 8 : i32
    %c0_i32_8 = arith.constant 0 : i32
    %c4_i32 = arith.constant 4 : i32
    %6 = arith.addi %c0_i32_8, %c4_i32 : i32
    %c1_i32_9 = arith.constant 1 : i32
    scf.for %arg10 = %c0_i32_8 to %6 step %c1_i32_9  : i32 {
      %cst_11 = arith.constant 0.000000e+00 : f32
      %7 = vector.broadcast %cst_11 : f32 to vector<4x8xf32>
      %c2_i32 = arith.constant 2 : i32
      %8 = arith.muli %arg10, %c2_i32 : i32
      %c0_i32_12 = arith.constant 0 : i32
      %9 = arith.addi %8, %c0_i32_12 : i32
      %c12_i32 = arith.constant 12 : i32
      %10 = arith.muli %9, %c12_i32 : i32
      %c0_i32_13 = arith.constant 0 : i32
      %11 = arith.addi %10, %c0_i32_13 : i32
      %12 = arith.index_cast %11 : i32 to index
      %c0_14 = arith.constant 0 : index
      %13 = tpu.strided_load %arg9[%12, %c0_14] {strides = array<i32: 2, 1>} : memref<144x8xf32, #tpu.memory_space<vmem>>, vector<4x8xf32>
      %c0_15 = arith.constant 0 : index
      %c0_16 = arith.constant 0 : index
      %c0_17 = arith.constant 0 : index
      %14 = vector.load %arg6[%c0_15, %c0_16, %c0_17] : memref<25x8x8xf32, #tpu.memory_space<vmem>>, vector<1x8x8xf32>
      %15 = vector.shape_cast %14 : vector<1x8x8xf32> to vector<8x8xf32>
      %cst_18 = arith.constant dense<0.000000e+00> : vector<4x8xf32>
      %16 = tpu.matmul %13, %15, %cst_18 {dimension_numbers = #tpu.dot_dimension_numbers<[1], [0], [0], [1], [0, 0, 1, 1], [], []>} : vector<4x8xf32>, vector<8x8xf32>, vector<4x8xf32> -> vector<4x8xf32>
      %17 = arith.addf %7, %16 : vector<4x8xf32>
      %c1_i32_19 = arith.constant 1 : i32
      %18 = arith.addi %10, %c1_i32_19 : i32
      %19 = arith.index_cast %18 : i32 to index
      %c0_20 = arith.constant 0 : index
      %20 = tpu.strided_load %arg9[%19, %c0_20] {strides = array<i32: 2, 1>} : memref<144x8xf32, #tpu.memory_space<vmem>>, vector<4x8xf32>
      %c1 = arith.constant 1 : index
      %c0_21 = arith.constant 0 : index
      %c0_22 = arith.constant 0 : index
      %21 = vector.load %arg6[%c1, %c0_21, %c0_22] : memref<25x8x8xf32, #tpu.memory_space<vmem>>, vector<1x8x8xf32>
      %22 = vector.shape_cast %21 : vector<1x8x8xf32> to vector<8x8xf32>
      %cst_23 = arith.constant dense<0.000000e+00> : vector<4x8xf32>
      %23 = tpu.matmul %20, %22, %cst_23 {dimension_numbers = #tpu.dot_dimension_numbers<[1], [0], [0], [1], [0, 0, 1, 1], [], []>} : vector<4x8xf32>, vector<8x8xf32>, vector<4x8xf32> -> vector<4x8xf32>
      %24 = arith.addf %17, %23 : vector<4x8xf32>
      %c2_i32_24 = arith.constant 2 : i32
      %25 = arith.addi %10, %c2_i32_24 : i32
      %26 = arith.index_cast %25 : i32 to index
      %c0_25 = arith.constant 0 : index
      %27 = tpu.strided_load %arg9[%26, %c0_25] {strides = array<i32: 2, 1>} : memref<144x8xf32, #tpu.memory_space<vmem>>, vector<4x8xf32>
      %c2 = arith.constant 2 : index
      %c0_26 = arith.constant 0 : index
      %c0_27 = arith.constant 0 : index
      %28 = vector.load %arg6[%c2, %c0_26, %c0_27] : memref<25x8x8xf32, #tpu.memory_space<vmem>>, vector<1x8x8xf32>
      %29 = vector.shape_cast %28 : vector<1x8x8xf32> to vector<8x8xf32>
      %cst_28 = arith.constant dense<0.000000e+00> : vector<4x8xf32>
      %30 = tpu.matmul %27, %29, %cst_28 {dimension_numbers = #tpu.dot_dimension_numbers<[1], [0], [0], [1], [0, 0, 1, 1], [], []>} : vector<4x8xf32>, vector<8x8xf32>, vector<4x8xf32> -> vector<4x8xf32>
      %31 = arith.addf %24, %30 : vector<4x8xf32>
      %c3_i32 = arith.constant 3 : i32
      %32 = arith.addi %10, %c3_i32 : i32
      %33 = arith.index_cast %32 : i32 to index
      %c0_29 = arith.constant 0 : index
      %34 = tpu.strided_load %arg9[%33, %c0_29] {strides = array<i32: 2, 1>} : memref<144x8xf32, #tpu.memory_space<vmem>>, vector<4x8xf32>
      %c3 = arith.constant 3 : index
      %c0_30 = arith.constant 0 : index
      %c0_31 = arith.constant 0 : index
      %35 = vector.load %arg6[%c3, %c0_30, %c0_31] : memref<25x8x8xf32, #tpu.memory_space<vmem>>, vector<1x8x8xf32>
      %36 = vector.shape_cast %35 : vector<1x8x8xf32> to vector<8x8xf32>
      %cst_32 = arith.constant dense<0.000000e+00> : vector<4x8xf32>
      %37 = tpu.matmul %34, %36, %cst_32 {dimension_numbers = #tpu.dot_dimension_numbers<[1], [0], [0], [1], [0, 0, 1, 1], [], []>} : vector<4x8xf32>, vector<8x8xf32>, vector<4x8xf32> -> vector<4x8xf32>
      %38 = arith.addf %31, %37 : vector<4x8xf32>
      %c4_i32_33 = arith.constant 4 : i32
      %39 = arith.addi %10, %c4_i32_33 : i32
      %40 = arith.index_cast %39 : i32 to index
      %c0_34 = arith.constant 0 : index
      %41 = tpu.strided_load %arg9[%40, %c0_34] {strides = array<i32: 2, 1>} : memref<144x8xf32, #tpu.memory_space<vmem>>, vector<4x8xf32>
      %c4 = arith.constant 4 : index
      %c0_35 = arith.constant 0 : index
      %c0_36 = arith.constant 0 : index
      %42 = vector.load %arg6[%c4, %c0_35, %c0_36] : memref<25x8x8xf32, #tpu.memory_space<vmem>>, vector<1x8x8xf32>
      %43 = vector.shape_cast %42 : vector<1x8x8xf32> to vector<8x8xf32>
      %cst_37 = arith.constant dense<0.000000e+00> : vector<4x8xf32>
      %44 = tpu.matmul %41, %43, %cst_37 {dimension_numbers = #tpu.dot_dimension_numbers<[1], [0], [0], [1], [0, 0, 1, 1], [], []>} : vector<4x8xf32>, vector<8x8xf32>, vector<4x8xf32> -> vector<4x8xf32>
      %45 = arith.addf %38, %44 : vector<4x8xf32>
      %c2_i32_38 = arith.constant 2 : i32
      %46 = arith.muli %arg10, %c2_i32_38 : i32
      %c1_i32_39 = arith.constant 1 : i32
      %47 = arith.addi %46, %c1_i32_39 : i32
      %c12_i32_40 = arith.constant 12 : i32
      %48 = arith.muli %47, %c12_i32_40 : i32
      %c0_i32_41 = arith.constant 0 : i32
      %49 = arith.addi %48, %c0_i32_41 : i32
      %50 = arith.index_cast %49 : i32 to index
      %c0_42 = arith.constant 0 : index
      %51 = tpu.strided_load %arg9[%50, %c0_42] {strides = array<i32: 2, 1>} : memref<144x8xf32, #tpu.memory_space<vmem>>, vector<4x8xf32>
      %c5 = arith.constant 5 : index
      %c0_43 = arith.constant 0 : index
      %c0_44 = arith.constant 0 : index
      %52 = vector.load %arg6[%c5, %c0_43, %c0_44] : memref<25x8x8xf32, #tpu.memory_space<vmem>>, vector<1x8x8xf32>
      %53 = vector.shape_cast %52 : vector<1x8x8xf32> to vector<8x8xf32>
      %cst_45 = arith.constant dense<0.000000e+00> : vector<4x8xf32>
      %54 = tpu.matmul %51, %53, %cst_45 {dimension_numbers = #tpu.dot_dimension_numbers<[1], [0], [0], [1], [0, 0, 1, 1], [], []>} : vector<4x8xf32>, vector<8x8xf32>, vector<4x8xf32> -> vector<4x8xf32>
      %55 = arith.addf %45, %54 : vector<4x8xf32>
      %c1_i32_46 = arith.constant 1 : i32
      %56 = arith.addi %48, %c1_i32_46 : i32
      %57 = arith.index_cast %56 : i32 to index
      %c0_47 = arith.constant 0 : index
      %58 = tpu.strided_load %arg9[%57, %c0_47] {strides = array<i32: 2, 1>} : memref<144x8xf32, #tpu.memory_space<vmem>>, vector<4x8xf32>
      %c6 = arith.constant 6 : index
      %c0_48 = arith.constant 0 : index
      %c0_49 = arith.constant 0 : index
      %59 = vector.load %arg6[%c6, %c0_48, %c0_49] : memref<25x8x8xf32, #tpu.memory_space<vmem>>, vector<1x8x8xf32>
      %60 = vector.shape_cast %59 : vector<1x8x8xf32> to vector<8x8xf32>
      %cst_50 = arith.constant dense<0.000000e+00> : vector<4x8xf32>
      %61 = tpu.matmul %58, %60, %cst_50 {dimension_numbers = #tpu.dot_dimension_numbers<[1], [0], [0], [1], [0, 0, 1, 1], [], []>} : vector<4x8xf32>, vector<8x8xf32>, vector<4x8xf32> -> vector<4x8xf32>
      %62 = arith.addf %55, %61 : vector<4x8xf32>
      %c2_i32_51 = arith.constant 2 : i32
      %63 = arith.addi %48, %c2_i32_51 : i32
      %64 = arith.index_cast %63 : i32 to index
      %c0_52 = arith.constant 0 : index
      %65 = tpu.strided_load %arg9[%64, %c0_52] {strides = array<i32: 2, 1>} : memref<144x8xf32, #tpu.memory_space<vmem>>, vector<4x8xf32>
      %c7 = arith.constant 7 : index
      %c0_53 = arith.constant 0 : index
      %c0_54 = arith.constant 0 : index
      %66 = vector.load %arg6[%c7, %c0_53, %c0_54] : memref<25x8x8xf32, #tpu.memory_space<vmem>>, vector<1x8x8xf32>
      %67 = vector.shape_cast %66 : vector<1x8x8xf32> to vector<8x8xf32>
      %cst_55 = arith.constant dense<0.000000e+00> : vector<4x8xf32>
      %68 = tpu.matmul %65, %67, %cst_55 {dimension_numbers = #tpu.dot_dimension_numbers<[1], [0], [0], [1], [0, 0, 1, 1], [], []>} : vector<4x8xf32>, vector<8x8xf32>, vector<4x8xf32> -> vector<4x8xf32>
      %69 = arith.addf %62, %68 : vector<4x8xf32>
      %c3_i32_56 = arith.constant 3 : i32
      %70 = arith.addi %48, %c3_i32_56 : i32
      %71 = arith.index_cast %70 : i32 to index
      %c0_57 = arith.constant 0 : index
      %72 = tpu.strided_load %arg9[%71, %c0_57] {strides = array<i32: 2, 1>} : memref<144x8xf32, #tpu.memory_space<vmem>>, vector<4x8xf32>
      %c8 = arith.constant 8 : index
      %c0_58 = arith.constant 0 : index
      %c0_59 = arith.constant 0 : index
      %73 = vector.load %arg6[%c8, %c0_58, %c0_59] : memref<25x8x8xf32, #tpu.memory_space<vmem>>, vector<1x8x8xf32>
      %74 = vector.shape_cast %73 : vector<1x8x8xf32> to vector<8x8xf32>
      %cst_60 = arith.constant dense<0.000000e+00> : vector<4x8xf32>
      %75 = tpu.matmul %72, %74, %cst_60 {dimension_numbers = #tpu.dot_dimension_numbers<[1], [0], [0], [1], [0, 0, 1, 1], [], []>} : vector<4x8xf32>, vector<8x8xf32>, vector<4x8xf32> -> vector<4x8xf32>
      %76 = arith.addf %69, %75 : vector<4x8xf32>
      %c4_i32_61 = arith.constant 4 : i32
      %77 = arith.addi %48, %c4_i32_61 : i32
      %78 = arith.index_cast %77 : i32 to index
      %c0_62 = arith.constant 0 : index
      %79 = tpu.strided_load %arg9[%78, %c0_62] {strides = array<i32: 2, 1>} : memref<144x8xf32, #tpu.memory_space<vmem>>, vector<4x8xf32>
      %c9 = arith.constant 9 : index
      %c0_63 = arith.constant 0 : index
      %c0_64 = arith.constant 0 : index
      %80 = vector.load %arg6[%c9, %c0_63, %c0_64] : memref<25x8x8xf32, #tpu.memory_space<vmem>>, vector<1x8x8xf32>
      %81 = vector.shape_cast %80 : vector<1x8x8xf32> to vector<8x8xf32>
      %cst_65 = arith.constant dense<0.000000e+00> : vector<4x8xf32>
      %82 = tpu.matmul %79, %81, %cst_65 {dimension_numbers = #tpu.dot_dimension_numbers<[1], [0], [0], [1], [0, 0, 1, 1], [], []>} : vector<4x8xf32>, vector<8x8xf32>, vector<4x8xf32> -> vector<4x8xf32>
      %83 = arith.addf %76, %82 : vector<4x8xf32>
      %c2_i32_66 = arith.constant 2 : i32
      %84 = arith.muli %arg10, %c2_i32_66 : i32
      %c2_i32_67 = arith.constant 2 : i32
      %85 = arith.addi %84, %c2_i32_67 : i32
      %c12_i32_68 = arith.constant 12 : i32
      %86 = arith.muli %85, %c12_i32_68 : i32
      %c0_i32_69 = arith.constant 0 : i32
      %87 = arith.addi %86, %c0_i32_69 : i32
      %88 = arith.index_cast %87 : i32 to index
      %c0_70 = arith.constant 0 : index
      %89 = tpu.strided_load %arg9[%88, %c0_70] {strides = array<i32: 2, 1>} : memref<144x8xf32, #tpu.memory_space<vmem>>, vector<4x8xf32>
      %c10 = arith.constant 10 : index
      %c0_71 = arith.constant 0 : index
      %c0_72 = arith.constant 0 : index
      %90 = vector.load %arg6[%c10, %c0_71, %c0_72] : memref<25x8x8xf32, #tpu.memory_space<vmem>>, vector<1x8x8xf32>
      %91 = vector.shape_cast %90 : vector<1x8x8xf32> to vector<8x8xf32>
      %cst_73 = arith.constant dense<0.000000e+00> : vector<4x8xf32>
      %92 = tpu.matmul %89, %91, %cst_73 {dimension_numbers = #tpu.dot_dimension_numbers<[1], [0], [0], [1], [0, 0, 1, 1], [], []>} : vector<4x8xf32>, vector<8x8xf32>, vector<4x8xf32> -> vector<4x8xf32>
      %93 = arith.addf %83, %92 : vector<4x8xf32>
      %c1_i32_74 = arith.constant 1 : i32
      %94 = arith.addi %86, %c1_i32_74 : i32
      %95 = arith.index_cast %94 : i32 to index
      %c0_75 = arith.constant 0 : index
      %96 = tpu.strided_load %arg9[%95, %c0_75] {strides = array<i32: 2, 1>} : memref<144x8xf32, #tpu.memory_space<vmem>>, vector<4x8xf32>
      %c11 = arith.constant 11 : index
      %c0_76 = arith.constant 0 : index
      %c0_77 = arith.constant 0 : index
      %97 = vector.load %arg6[%c11, %c0_76, %c0_77] : memref<25x8x8xf32, #tpu.memory_space<vmem>>, vector<1x8x8xf32>
      %98 = vector.shape_cast %97 : vector<1x8x8xf32> to vector<8x8xf32>
      %cst_78 = arith.constant dense<0.000000e+00> : vector<4x8xf32>
      %99 = tpu.matmul %96, %98, %cst_78 {dimension_numbers = #tpu.dot_dimension_numbers<[1], [0], [0], [1], [0, 0, 1, 1], [], []>} : vector<4x8xf32>, vector<8x8xf32>, vector<4x8xf32> -> vector<4x8xf32>
      %100 = arith.addf %93, %99 : vector<4x8xf32>
      %c2_i32_79 = arith.constant 2 : i32
      %101 = arith.addi %86, %c2_i32_79 : i32
      %102 = arith.index_cast %101 : i32 to index
      %c0_80 = arith.constant 0 : index
      %103 = tpu.strided_load %arg9[%102, %c0_80] {strides = array<i32: 2, 1>} : memref<144x8xf32, #tpu.memory_space<vmem>>, vector<4x8xf32>
      %c12 = arith.constant 12 : index
      %c0_81 = arith.constant 0 : index
      %c0_82 = arith.constant 0 : index
      %104 = vector.load %arg6[%c12, %c0_81, %c0_82] : memref<25x8x8xf32, #tpu.memory_space<vmem>>, vector<1x8x8xf32>
      %105 = vector.shape_cast %104 : vector<1x8x8xf32> to vector<8x8xf32>
      %cst_83 = arith.constant dense<0.000000e+00> : vector<4x8xf32>
      %106 = tpu.matmul %103, %105, %cst_83 {dimension_numbers = #tpu.dot_dimension_numbers<[1], [0], [0], [1], [0, 0, 1, 1], [], []>} : vector<4x8xf32>, vector<8x8xf32>, vector<4x8xf32> -> vector<4x8xf32>
      %107 = arith.addf %100, %106 : vector<4x8xf32>
      %c3_i32_84 = arith.constant 3 : i32
      %108 = arith.addi %86, %c3_i32_84 : i32
      %109 = arith.index_cast %108 : i32 to index
      %c0_85 = arith.constant 0 : index
      %110 = tpu.strided_load %arg9[%109, %c0_85] {strides = array<i32: 2, 1>} : memref<144x8xf32, #tpu.memory_space<vmem>>, vector<4x8xf32>
      %c13 = arith.constant 13 : index
      %c0_86 = arith.constant 0 : index
      %c0_87 = arith.constant 0 : index
      %111 = vector.load %arg6[%c13, %c0_86, %c0_87] : memref<25x8x8xf32, #tpu.memory_space<vmem>>, vector<1x8x8xf32>
      %112 = vector.shape_cast %111 : vector<1x8x8xf32> to vector<8x8xf32>
      %cst_88 = arith.constant dense<0.000000e+00> : vector<4x8xf32>
      %113 = tpu.matmul %110, %112, %cst_88 {dimension_numbers = #tpu.dot_dimension_numbers<[1], [0], [0], [1], [0, 0, 1, 1], [], []>} : vector<4x8xf32>, vector<8x8xf32>, vector<4x8xf32> -> vector<4x8xf32>
      %114 = arith.addf %107, %113 : vector<4x8xf32>
      %c4_i32_89 = arith.constant 4 : i32
      %115 = arith.addi %86, %c4_i32_89 : i32
      %116 = arith.index_cast %115 : i32 to index
      %c0_90 = arith.constant 0 : index
      %117 = tpu.strided_load %arg9[%116, %c0_90] {strides = array<i32: 2, 1>} : memref<144x8xf32, #tpu.memory_space<vmem>>, vector<4x8xf32>
      %c14 = arith.constant 14 : index
      %c0_91 = arith.constant 0 : index
      %c0_92 = arith.constant 0 : index
      %118 = vector.load %arg6[%c14, %c0_91, %c0_92] : memref<25x8x8xf32, #tpu.memory_space<vmem>>, vector<1x8x8xf32>
      %119 = vector.shape_cast %118 : vector<1x8x8xf32> to vector<8x8xf32>
      %cst_93 = arith.constant dense<0.000000e+00> : vector<4x8xf32>
      %120 = tpu.matmul %117, %119, %cst_93 {dimension_numbers = #tpu.dot_dimension_numbers<[1], [0], [0], [1], [0, 0, 1, 1], [], []>} : vector<4x8xf32>, vector<8x8xf32>, vector<4x8xf32> -> vector<4x8xf32>
      %121 = arith.addf %114, %120 : vector<4x8xf32>
      %c2_i32_94 = arith.constant 2 : i32
      %122 = arith.muli %arg10, %c2_i32_94 : i32
      %c3_i32_95 = arith.constant 3 : i32
      %123 = arith.addi %122, %c3_i32_95 : i32
      %c12_i32_96 = arith.constant 12 : i32
      %124 = arith.muli %123, %c12_i32_96 : i32
      %c0_i32_97 = arith.constant 0 : i32
      %125 = arith.addi %124, %c0_i32_97 : i32
      %126 = arith.index_cast %125 : i32 to index
      %c0_98 = arith.constant 0 : index
      %127 = tpu.strided_load %arg9[%126, %c0_98] {strides = array<i32: 2, 1>} : memref<144x8xf32, #tpu.memory_space<vmem>>, vector<4x8xf32>
      %c15 = arith.constant 15 : index
      %c0_99 = arith.constant 0 : index
      %c0_100 = arith.constant 0 : index
      %128 = vector.load %arg6[%c15, %c0_99, %c0_100] : memref<25x8x8xf32, #tpu.memory_space<vmem>>, vector<1x8x8xf32>
      %129 = vector.shape_cast %128 : vector<1x8x8xf32> to vector<8x8xf32>
      %cst_101 = arith.constant dense<0.000000e+00> : vector<4x8xf32>
      %130 = tpu.matmul %127, %129, %cst_101 {dimension_numbers = #tpu.dot_dimension_numbers<[1], [0], [0], [1], [0, 0, 1, 1], [], []>} : vector<4x8xf32>, vector<8x8xf32>, vector<4x8xf32> -> vector<4x8xf32>
      %131 = arith.addf %121, %130 : vector<4x8xf32>
      %c1_i32_102 = arith.constant 1 : i32
      %132 = arith.addi %124, %c1_i32_102 : i32
      %133 = arith.index_cast %132 : i32 to index
      %c0_103 = arith.constant 0 : index
      %134 = tpu.strided_load %arg9[%133, %c0_103] {strides = array<i32: 2, 1>} : memref<144x8xf32, #tpu.memory_space<vmem>>, vector<4x8xf32>
      %c16 = arith.constant 16 : index
      %c0_104 = arith.constant 0 : index
      %c0_105 = arith.constant 0 : index
      %135 = vector.load %arg6[%c16, %c0_104, %c0_105] : memref<25x8x8xf32, #tpu.memory_space<vmem>>, vector<1x8x8xf32>
      %136 = vector.shape_cast %135 : vector<1x8x8xf32> to vector<8x8xf32>
      %cst_106 = arith.constant dense<0.000000e+00> : vector<4x8xf32>
      %137 = tpu.matmul %134, %136, %cst_106 {dimension_numbers = #tpu.dot_dimension_numbers<[1], [0], [0], [1], [0, 0, 1, 1], [], []>} : vector<4x8xf32>, vector<8x8xf32>, vector<4x8xf32> -> vector<4x8xf32>
      %138 = arith.addf %131, %137 : vector<4x8xf32>
      %c2_i32_107 = arith.constant 2 : i32
      %139 = arith.addi %124, %c2_i32_107 : i32
      %140 = arith.index_cast %139 : i32 to index
      %c0_108 = arith.constant 0 : index
      %141 = tpu.strided_load %arg9[%140, %c0_108] {strides = array<i32: 2, 1>} : memref<144x8xf32, #tpu.memory_space<vmem>>, vector<4x8xf32>
      %c17 = arith.constant 17 : index
      %c0_109 = arith.constant 0 : index
      %c0_110 = arith.constant 0 : index
      %142 = vector.load %arg6[%c17, %c0_109, %c0_110] : memref<25x8x8xf32, #tpu.memory_space<vmem>>, vector<1x8x8xf32>
      %143 = vector.shape_cast %142 : vector<1x8x8xf32> to vector<8x8xf32>
      %cst_111 = arith.constant dense<0.000000e+00> : vector<4x8xf32>
      %144 = tpu.matmul %141, %143, %cst_111 {dimension_numbers = #tpu.dot_dimension_numbers<[1], [0], [0], [1], [0, 0, 1, 1], [], []>} : vector<4x8xf32>, vector<8x8xf32>, vector<4x8xf32> -> vector<4x8xf32>
      %145 = arith.addf %138, %144 : vector<4x8xf32>
      %c3_i32_112 = arith.constant 3 : i32
      %146 = arith.addi %124, %c3_i32_112 : i32
      %147 = arith.index_cast %146 : i32 to index
      %c0_113 = arith.constant 0 : index
      %148 = tpu.strided_load %arg9[%147, %c0_113] {strides = array<i32: 2, 1>} : memref<144x8xf32, #tpu.memory_space<vmem>>, vector<4x8xf32>
      %c18 = arith.constant 18 : index
      %c0_114 = arith.constant 0 : index
      %c0_115 = arith.constant 0 : index
      %149 = vector.load %arg6[%c18, %c0_114, %c0_115] : memref<25x8x8xf32, #tpu.memory_space<vmem>>, vector<1x8x8xf32>
      %150 = vector.shape_cast %149 : vector<1x8x8xf32> to vector<8x8xf32>
      %cst_116 = arith.constant dense<0.000000e+00> : vector<4x8xf32>
      %151 = tpu.matmul %148, %150, %cst_116 {dimension_numbers = #tpu.dot_dimension_numbers<[1], [0], [0], [1], [0, 0, 1, 1], [], []>} : vector<4x8xf32>, vector<8x8xf32>, vector<4x8xf32> -> vector<4x8xf32>
      %152 = arith.addf %145, %151 : vector<4x8xf32>
      %c4_i32_117 = arith.constant 4 : i32
      %153 = arith.addi %124, %c4_i32_117 : i32
      %154 = arith.index_cast %153 : i32 to index
      %c0_118 = arith.constant 0 : index
      %155 = tpu.strided_load %arg9[%154, %c0_118] {strides = array<i32: 2, 1>} : memref<144x8xf32, #tpu.memory_space<vmem>>, vector<4x8xf32>
      %c19 = arith.constant 19 : index
      %c0_119 = arith.constant 0 : index
      %c0_120 = arith.constant 0 : index
      %156 = vector.load %arg6[%c19, %c0_119, %c0_120] : memref<25x8x8xf32, #tpu.memory_space<vmem>>, vector<1x8x8xf32>
      %157 = vector.shape_cast %156 : vector<1x8x8xf32> to vector<8x8xf32>
      %cst_121 = arith.constant dense<0.000000e+00> : vector<4x8xf32>
      %158 = tpu.matmul %155, %157, %cst_121 {dimension_numbers = #tpu.dot_dimension_numbers<[1], [0], [0], [1], [0, 0, 1, 1], [], []>} : vector<4x8xf32>, vector<8x8xf32>, vector<4x8xf32> -> vector<4x8xf32>
      %159 = arith.addf %152, %158 : vector<4x8xf32>
      %c2_i32_122 = arith.constant 2 : i32
      %160 = arith.muli %arg10, %c2_i32_122 : i32
      %c4_i32_123 = arith.constant 4 : i32
      %161 = arith.addi %160, %c4_i32_123 : i32
      %c12_i32_124 = arith.constant 12 : i32
      %162 = arith.muli %161, %c12_i32_124 : i32
      %c0_i32_125 = arith.constant 0 : i32
      %163 = arith.addi %162, %c0_i32_125 : i32
      %164 = arith.index_cast %163 : i32 to index
      %c0_126 = arith.constant 0 : index
      %165 = tpu.strided_load %arg9[%164, %c0_126] {strides = array<i32: 2, 1>} : memref<144x8xf32, #tpu.memory_space<vmem>>, vector<4x8xf32>
      %c20 = arith.constant 20 : index
      %c0_127 = arith.constant 0 : index
      %c0_128 = arith.constant 0 : index
      %166 = vector.load %arg6[%c20, %c0_127, %c0_128] : memref<25x8x8xf32, #tpu.memory_space<vmem>>, vector<1x8x8xf32>
      %167 = vector.shape_cast %166 : vector<1x8x8xf32> to vector<8x8xf32>
      %cst_129 = arith.constant dense<0.000000e+00> : vector<4x8xf32>
      %168 = tpu.matmul %165, %167, %cst_129 {dimension_numbers = #tpu.dot_dimension_numbers<[1], [0], [0], [1], [0, 0, 1, 1], [], []>} : vector<4x8xf32>, vector<8x8xf32>, vector<4x8xf32> -> vector<4x8xf32>
      %169 = arith.addf %159, %168 : vector<4x8xf32>
      %c1_i32_130 = arith.constant 1 : i32
      %170 = arith.addi %162, %c1_i32_130 : i32
      %171 = arith.index_cast %170 : i32 to index
      %c0_131 = arith.constant 0 : index
      %172 = tpu.strided_load %arg9[%171, %c0_131] {strides = array<i32: 2, 1>} : memref<144x8xf32, #tpu.memory_space<vmem>>, vector<4x8xf32>
      %c21 = arith.constant 21 : index
      %c0_132 = arith.constant 0 : index
      %c0_133 = arith.constant 0 : index
      %173 = vector.load %arg6[%c21, %c0_132, %c0_133] : memref<25x8x8xf32, #tpu.memory_space<vmem>>, vector<1x8x8xf32>
      %174 = vector.shape_cast %173 : vector<1x8x8xf32> to vector<8x8xf32>
      %cst_134 = arith.constant dense<0.000000e+00> : vector<4x8xf32>
      %175 = tpu.matmul %172, %174, %cst_134 {dimension_numbers = #tpu.dot_dimension_numbers<[1], [0], [0], [1], [0, 0, 1, 1], [], []>} : vector<4x8xf32>, vector<8x8xf32>, vector<4x8xf32> -> vector<4x8xf32>
      %176 = arith.addf %169, %175 : vector<4x8xf32>
      %c2_i32_135 = arith.constant 2 : i32
      %177 = arith.addi %162, %c2_i32_135 : i32
      %178 = arith.index_cast %177 : i32 to index
      %c0_136 = arith.constant 0 : index
      %179 = tpu.strided_load %arg9[%178, %c0_136] {strides = array<i32: 2, 1>} : memref<144x8xf32, #tpu.memory_space<vmem>>, vector<4x8xf32>
      %c22 = arith.constant 22 : index
      %c0_137 = arith.constant 0 : index
      %c0_138 = arith.constant 0 : index
      %180 = vector.load %arg6[%c22, %c0_137, %c0_138] : memref<25x8x8xf32, #tpu.memory_space<vmem>>, vector<1x8x8xf32>
      %181 = vector.shape_cast %180 : vector<1x8x8xf32> to vector<8x8xf32>
      %cst_139 = arith.constant dense<0.000000e+00> : vector<4x8xf32>
      %182 = tpu.matmul %179, %181, %cst_139 {dimension_numbers = #tpu.dot_dimension_numbers<[1], [0], [0], [1], [0, 0, 1, 1], [], []>} : vector<4x8xf32>, vector<8x8xf32>, vector<4x8xf32> -> vector<4x8xf32>
      %183 = arith.addf %176, %182 : vector<4x8xf32>
      %c3_i32_140 = arith.constant 3 : i32
      %184 = arith.addi %162, %c3_i32_140 : i32
      %185 = arith.index_cast %184 : i32 to index
      %c0_141 = arith.constant 0 : index
      %186 = tpu.strided_load %arg9[%185, %c0_141] {strides = array<i32: 2, 1>} : memref<144x8xf32, #tpu.memory_space<vmem>>, vector<4x8xf32>
      %c23 = arith.constant 23 : index
      %c0_142 = arith.constant 0 : index
      %c0_143 = arith.constant 0 : index
      %187 = vector.load %arg6[%c23, %c0_142, %c0_143] : memref<25x8x8xf32, #tpu.memory_space<vmem>>, vector<1x8x8xf32>
      %188 = vector.shape_cast %187 : vector<1x8x8xf32> to vector<8x8xf32>
      %cst_144 = arith.constant dense<0.000000e+00> : vector<4x8xf32>
      %189 = tpu.matmul %186, %188, %cst_144 {dimension_numbers = #tpu.dot_dimension_numbers<[1], [0], [0], [1], [0, 0, 1, 1], [], []>} : vector<4x8xf32>, vector<8x8xf32>, vector<4x8xf32> -> vector<4x8xf32>
      %190 = arith.addf %183, %189 : vector<4x8xf32>
      %c4_i32_145 = arith.constant 4 : i32
      %191 = arith.addi %162, %c4_i32_145 : i32
      %192 = arith.index_cast %191 : i32 to index
      %c0_146 = arith.constant 0 : index
      %193 = tpu.strided_load %arg9[%192, %c0_146] {strides = array<i32: 2, 1>} : memref<144x8xf32, #tpu.memory_space<vmem>>, vector<4x8xf32>
      %c24 = arith.constant 24 : index
      %c0_147 = arith.constant 0 : index
      %c0_148 = arith.constant 0 : index
      %194 = vector.load %arg6[%c24, %c0_147, %c0_148] : memref<25x8x8xf32, #tpu.memory_space<vmem>>, vector<1x8x8xf32>
      %195 = vector.shape_cast %194 : vector<1x8x8xf32> to vector<8x8xf32>
      %cst_149 = arith.constant dense<0.000000e+00> : vector<4x8xf32>
      %196 = tpu.matmul %193, %195, %cst_149 {dimension_numbers = #tpu.dot_dimension_numbers<[1], [0], [0], [1], [0, 0, 1, 1], [], []>} : vector<4x8xf32>, vector<8x8xf32>, vector<4x8xf32> -> vector<4x8xf32>
      %197 = arith.addf %190, %196 : vector<4x8xf32>
      %c4_i32_150 = arith.constant 4 : i32
      %198 = arith.muli %arg10, %c4_i32_150 : i32
      %c0_151 = arith.constant 0 : index
      %199 = arith.index_cast %198 : i32 to index
      %c0_152 = arith.constant 0 : index
      %200 = vector.load %arg7[%c0_151, %199, %c0_152] : memref<1x16x8xf32, #tpu.memory_space<vmem>>, vector<1x4x8xf32>
      %201 = vector.shape_cast %200 : vector<1x4x8xf32> to vector<4x8xf32>
      %202 = vector.shape_cast %197 : vector<4x8xf32> to vector<1x4x8xf32>
      tpu.vector_store %arg7[%c0_151, %199, %c0_152], %202 {strides = array<i32>} : memref<1x16x8xf32, #tpu.memory_space<vmem>>, vector<1x4x8xf32>,
    }
    %c4_i32_10 = arith.constant 4 : i32
    return
  }
  func.func @transform_0(%arg0: i32) -> (i32, i32, i32) {
    %c0_i32 = arith.constant 0 : i32
    %c0_i32_0 = arith.constant 0 : i32
    %c0_i32_1 = arith.constant 0 : i32
    return %arg0, %c0_i32, %c0_i32_0 : i32, i32, i32
  }
  func.func @transform_1(%arg0: i32) -> (i32, i32, i32) {
    %c0_i32 = arith.constant 0 : i32
    %c0_i32_0 = arith.constant 0 : i32
    %c0_i32_1 = arith.constant 0 : i32
    %c0_i32_2 = arith.constant 0 : i32
    return %c0_i32, %c0_i32_0, %c0_i32_1 : i32, i32, i32
  }
  func.func @transform_2(%arg0: i32) -> (i32, i32) {
    %c0_i32 = arith.constant 0 : i32
    %c0_i32_0 = arith.constant 0 : i32
    %c0_i32_1 = arith.constant 0 : i32
    return %c0_i32, %c0_i32_0 : i32, i32
  }
  func.func @transform_3(%arg0: i32) -> (i32, i32, i32) {
    %c0_i32 = arith.constant 0 : i32
    %c0_i32_0 = arith.constant 0 : i32
    %c0_i32_1 = arith.constant 0 : i32
    %c0_i32_2 = arith.constant 0 : i32
    return %c0_i32, %c0_i32_0, %c0_i32_1 : i32, i32, i32
  }
  func.func @transform_4(%arg0: i32) -> (i32, i32) {
    %c0_i32 = arith.constant 0 : i32
    %c0_i32_0 = arith.constant 0 : i32
    %c0_i32_1 = arith.constant 0 : i32
    return %c0_i32, %c0_i32_0 : i32, i32
  }
  func.func @transform_5(%arg0: i32) -> (i32, i32, i32) {
    %c0_i32 = arith.constant 0 : i32
    %c0_i32_0 = arith.constant 0 : i32
    %c0_i32_1 = arith.constant 0 : i32
    %c0_i32_2 = arith.constant 0 : i32
    return %c0_i32, %c0_i32_0, %c0_i32_1 : i32, i32, i32
  }
  func.func @transform_6(%arg0: i32) -> (i32, i32, i32) {
    %c0_i32 = arith.constant 0 : i32
    %c0_i32_0 = arith.constant 0 : i32
    %c0_i32_1 = arith.constant 0 : i32
    return %arg0, %c0_i32, %c0_i32_0 : i32, i32, i32
  }
}

</mosaic_0001>

<bundles_post_ra>
// kernel: forward.1
= control target key start
LH: loop header
LB: loop body
LE: loop exit
PB: predicated region body
PF: predicated region fallthrough
CT: control target
= control target key end

     0   :  { %11 = vsyncpa [#allocation5], 0  ;;  %s7172_s0 = inlined_call_operand.vmem [shape: f32[2,324,8], index: 0, kind: input, shape index: {}]   ;;  %s7173_s1 = inlined_call_operand.vmem [shape: f32[9,8,8], index: 1, kind: input, shape index: {}]   ;;  %s7174_s2 = inlined_call_operand.vmem [shape: f32[1,8], index: 2, kind: input, shape index: {}, may-alias: {2,4}]   ;;  %s7175_s3 = inlined_call_operand.vmem [shape: f32[25,8,8], index: 3, kind: input, shape index: {}]   ;;  %s7176_s4 = inlined_call_operand.vmem [shape: f32[1,8], index: 4, kind: input, shape index: {}, may-alias: {2,4}]   ;;  %s7177_s5 = inlined_call_operand.vmem [shape: f32[25,8,8], index: 5, kind: input, shape index: {}]   ;;  %s7178_s6 = inlined_call_operand.hbm [shape: f32[2,16,8], index: 6, kind: output, shape index: {}]  }
   0x1   :  { %13 = vsyncpa [#allocation5 + $0x1], 0  ;;  %s6409_s21 = smov 0   ;;  %s6411_s22 = smov 0  }
   0x2   :  { %s6413_s23 = smov 0   ;;  %s6415_s24 = smov 0  }
   0x3 LB: > { %s6430_s25 = sadd.s32 4294967295, %s6352_s24   ;;  %s5436_s26 = sadd.s32 4294967294, %s6352_s24   ;;  %s6352_s24 = sphi %s6415_s24, %s7184_s24   ;;  %s6348_s23 = sphi %s6413_s23, %s7183_s23   ;;  %s6344_s22 = sphi %s6411_s22, %s7182_s22   ;;  %s6340_s21 = sphi %s6409_s21, %s7181_s21  }
   0x4   : > { %s6434_s27 = sadd.s32 1, %s6352_s24   ;;  %s157_s28 = sadd.s32 1, %s6348_s23 }
   0x5   : > { %s154_s29 = ssub.s32 %s6352_s24, %s6434_s27  ;;  %p167_p0 = scmp.ne.s32.totalorder %s6348_s23, %s6344_s22 }
   0x6   : > { %p155_p1 = scmp.eq.s32.totalorder %s154_s29, 0  ;;  %p168_p2 = scmp.eq.s32.totalorder %s6430_s25, 1 }
   0x7   : > { %p173_p3 = scmp.ne.s32.totalorder %s6344_s22, %s6340_s21  ;;  %p174_p4 = scmp.eq.s32.totalorder %s5436_s26, 1 }
   0x8   : > { %s6445_s30 = scalar_select %p155_p1, %s6348_s23, %s157_s28  }
   0x9   : > { %p6447_p5 = por %p168_p2, %p167_p0  ;;  %p6451_p6 = por %p174_p4, %p173_p3 }
   0xa   : > { %p5439_p7 = scmp.ge.s32.totalorder %s6352_s24, 1  ;;  %p215_p8 = scmp.lt.s32.totalorder %s6352_s24, 3 }
   0xc   : > { %p216_p9 = pnand %p5439_p7, %p215_p8 }
   0xd   : > { %s242_s9 = sand.u32 (!%p216_p9), 1, %s6344_s22   ;;  %p245_p10 = scmp.lt.s32.totalorder (!%p216_p9), %s6430_s25, 1  ;;  %vm250_vm0 = vcmask (!%p216_p9), 64512   ;;  %v6366_v0 = vmov (!%p216_p9), 0.0  }
   0xe   : > { %219 = sbr.rel (%p216_p9) target bundleno = 902 (0x386), region = 44  ;;  %s6461_s10 = sshll.u32 (!%p216_p9), %s242_s9, 4  ;;  %251 = vst.msk [vmem:[#allocation2] sm:$0xff] (!%p216_p9), %vm250_vm0, %v6366_v0  ;;  %252 = vst.msk [vmem:[#allocation2 + $0x8] sm:$0xff] (!%p216_p9), %vm250_vm0, %v6366_v0 }
   0xf   : > { %253 = vst.msk [vmem:[#allocation2 + $0x10] sm:$0xff] (!%p216_p9), %vm250_vm0, %v6366_v0  ;;  %254 = vst.msk [vmem:[#allocation2 + $0x18] sm:$0xff] (!%p216_p9), %vm250_vm0, %v6366_v0  ;;  %s244_s16 = scalar_lea.vmem (!%p216_p9), [#allocation4], %s6461_s10  ;;  %s6572_s17 = smov (!%p216_p9), 0  }
  0x10   : > { %255 = vst.msk [vmem:[#allocation2 + $0x20] sm:$0xff] (!%p216_p9), %vm250_vm0, %v6366_v0  ;;  %256 = vst.msk [vmem:[#allocation2 + $0x28] sm:$0xff] (!%p216_p9), %vm250_vm0, %v6366_v0 }
  0x11   : > { %257 = vst.msk [vmem:[#allocation2 + $0x30] sm:$0xff] (!%p216_p9), %vm250_vm0, %v6366_v0  ;;  %258 = vst.msk [vmem:[#allocation2 + $0x38] sm:$0xff] (!%p216_p9), %vm250_vm0, %v6366_v0 }
  0x12   : > { %259 = vst.msk [vmem:[#allocation2 + $0x40] sm:$0xff] (!%p216_p9), %vm250_vm0, %v6366_v0  ;;  %260 = vst.msk [vmem:[#allocation2 + $0x48] sm:$0xff] (!%p216_p9), %vm250_vm0, %v6366_v0 }
  0x13   : > { %261 = vst.msk [vmem:[#allocation2 + $0x50] sm:$0xff] (!%p216_p9), %vm250_vm0, %v6366_v0  ;;  %262 = vst.msk [vmem:[#allocation2 + $0x58] sm:$0xff] (!%p216_p9), %vm250_vm0, %v6366_v0 }
  0x14   : > { %263 = vst.msk [vmem:[#allocation2 + $0x60] sm:$0xff] (!%p216_p9), %vm250_vm0, %v6366_v0  ;;  %264 = vst.msk [vmem:[#allocation2 + $0x68] sm:$0xff] (!%p216_p9), %vm250_vm0, %v6366_v0 }
  0x15   : > { %265 = vst.msk [vmem:[#allocation2 + $0x70] sm:$0xff] %vm250_vm0, %v6366_v0  ;;  %266 = vst.msk [vmem:[#allocation2 + $0x78] sm:$0xff] %vm250_vm0, %v6366_v0  ;;  %s246_s11 = scalar_select %p245_p10, %s6430_s25, 1 }
  0x16   : > { %267 = vst.msk [vmem:[#allocation2 + $0x80] sm:$0xff] %vm250_vm0, %v6366_v0  ;;  %268 = vst.msk [vmem:[#allocation2 + $0x88] sm:$0xff] %vm250_vm0, %v6366_v0 }
  0x17   : > { %269 = vst.msk [vmem:[#allocation2 + $0x90] sm:$0xff] %vm250_vm0, %v6366_v0  ;;  %270 = vst.msk [vmem:[#allocation2 + $0x98] sm:$0xff] %vm250_vm0, %v6366_v0  ;;  %s6207_s12 = smul.u32 328, %s246_s11 }
  0x18   : > { %271 = vst.msk [vmem:[#allocation2 + $0xa0] sm:$0xff] %vm250_vm0, %v6366_v0  ;;  %272 = vst.msk [vmem:[#allocation2 + $0xa8] sm:$0xff] %vm250_vm0, %v6366_v0 }
  0x19   : > { %273 = vst.msk [vmem:[#allocation2 + $0xb0] sm:$0xff] %vm250_vm0, %v6366_v0  ;;  %274 = vst.msk [vmem:[#allocation2 + $0xb8] sm:$0xff] %vm250_vm0, %v6366_v0  ;;  %s6569_s15 = scalar_lea.vmem %s7172_s0, %s6207_s12 }
  0x1a   : > { %275 = vst.msk [vmem:[#allocation2 + $0xc0] sm:$0xff] %vm250_vm0, %v6366_v0  ;;  %276 = vst.msk [vmem:[#allocation2 + $0xc8] sm:$0xff] %vm250_vm0, %v6366_v0 }
  0x1b   : > { %277 = vst.msk [vmem:[#allocation2 + $0xd0] sm:$0xff] %vm250_vm0, %v6366_v0  ;;  %278 = vst.msk [vmem:[#allocation2 + $0xd8] sm:$0xff] %vm250_vm0, %v6366_v0 }
  0x1c   : > { %279 = vst.msk [vmem:[#allocation2 + $0xe0] sm:$0xff] %vm250_vm0, %v6366_v0  ;;  %280 = vst.msk [vmem:[#allocation2 + $0xe8] sm:$0xff] %vm250_vm0, %v6366_v0 }
  0x1d   : > { %281 = vst.msk [vmem:[#allocation2 + $0xf0] sm:$0xff] %vm250_vm0, %v6366_v0  ;;  %282 = vst.msk [vmem:[#allocation2 + $0xf8] sm:$0xff] %vm250_vm0, %v6366_v0 }
  0x1e   : > { %283 = vst.msk [vmem:[#allocation2 + $0x100] sm:$0xff] %vm250_vm0, %v6366_v0  ;;  %284 = vst.msk [vmem:[#allocation2 + $0x108] sm:$0xff] %vm250_vm0, %v6366_v0 }
  0x1f   : > { %285 = vst.msk [vmem:[#allocation2 + $0x110] sm:$0xff] %vm250_vm0, %v6366_v0  ;;  %286 = vst.msk [vmem:[#allocation2 + $0x118] sm:$0xff] %vm250_vm0, %v6366_v0 }
  0x20   : > { %287 = vst.msk [vmem:[#allocation2 + $0x120] sm:$0xff] %vm250_vm0, %v6366_v0  ;;  %288 = vst.msk [vmem:[#allocation2 + $0x128] sm:$0xff] %vm250_vm0, %v6366_v0 }
  0x21   : > { %289 = vst.msk [vmem:[#allocation2 + $0x130] sm:$0xff] %vm250_vm0, %v6366_v0  ;;  %290 = vst.msk [vmem:[#allocation2 + $0x138] sm:$0xff] %vm250_vm0, %v6366_v0 }
  0x22   : > { %291 = vst.msk [vmem:[#allocation2 + $0x140] sm:$0xff] %vm250_vm0, %v6366_v0  ;;  %292 = vst.msk [vmem:[#allocation2 + $0x148] sm:$0xff] %vm250_vm0, %v6366_v0 }
  0x23   : > { %293 = vst.msk [vmem:[#allocation2 + $0x150] sm:$0xff] %vm250_vm0, %v6366_v0  ;;  %294 = vst.msk [vmem:[#allocation2 + $0x158] sm:$0xff] %vm250_vm0, %v6366_v0 }
  0x24   : > { %295 = vst.msk [vmem:[#allocation2 + $0x160] sm:$0xff] %vm250_vm0, %v6366_v0  ;;  %296 = vst.msk [vmem:[#allocation2 + $0x168] sm:$0xff] %vm250_vm0, %v6366_v0 }
  0x25   : > { %297 = vst.msk [vmem:[#allocation2 + $0x170] sm:$0xff] %vm250_vm0, %v6366_v0  ;;  %298 = vst.msk [vmem:[#allocation2 + $0x178] sm:$0xff] %vm250_vm0, %v6366_v0 }
  0x26   : > { %299 = vst.msk [vmem:[#allocation2 + $0x180] sm:$0xff] %vm250_vm0, %v6366_v0  ;;  %300 = vst.msk [vmem:[#allocation2 + $0x188] sm:$0xff] %vm250_vm0, %v6366_v0 }
  0x27 LB: >> { %v5461_v1 = vld [vmem:[%s7173_s1 + $0x20] sm:$0xff]  ;;  %v5444_v2 = vld [vmem:[%s7173_s1 + $0x8] sm:$0xff]  ;;  %s307_s13 = smul.u32 18, %s6356_s17  ;;  %v5471_v11 = vld [vmem:[%s7173_s1 + $0x30] sm:$0xff]  ;;  %s6356_s17 = sphi %s6572_s17, %s306_s17  }
  0x28   : >> { %v5466_v3 = vld [vmem:[%s7173_s1 + $0x28] sm:$0xff]  ;;  %5869 = vmatprep.subr.mxu0 %v5461_v1  ;;  %5849 = vmatprep.subr.mxu1 %v5444_v2  ;;  %v311_v4 = vld [vmem:[%s7173_s1] sm:$0xff]  ;;  %v5451_v12 = vld [vmem:[%s7173_s1 + $0x10] sm:$0xff]  ;;  %s5196_s26 = smul.u32 20, %s6356_s17  ;;  %s306_s17 = sadd.s32 1, %s6356_s17  }
  0x29   : >> { %5870 = vmatpush3.msra.mxu0 %v5461_v1  ;;  %5850 = vmatpush3.msra.mxu1 %v5444_v2  ;;  %s6591_s14 = scalar_lea.vmem %s6569_s15, %s307_s13  ;;  %v5476_v17 = vld [vmem:[%s7173_s1 + $0x38] sm:$0xff]  ;;  %v5481_v23 = vld [vmem:[%s7173_s1 + $0x40] sm:$0xff]  ;;  %p303_p11 = scmp.ge.s32.totalorder %s306_s17, 16  }
  0x2a   : >> { %5874 = vmatprep.subr.mxu0 %v5466_v3  ;;  %5854 = vmatprep.subr.mxu1 %v311_v4  ;;  %v5442_v5 = vld [vmem:[%s6591_s14 + $0x1] sm:$0xff]  ;;  %v5459_v6 = vld [vmem:[%s6591_s14 + $0x13] sm:$0xff]  ;;  %v5443_v7 = vld [vmem:[%s6591_s14 + $0x9] sm:$0xff]  ;;  %s5197_s28 = scalar_lea.vmem [#allocation2], %s5196_s26  ;;  %1121 = vst.msk [vmem:[#allocation3] sm:$0xff] (%p303_p11), %vm250_vm0, %v6366_v0  ;;  %s6689_s15 = smov (%p303_p11), 0  }
  0x2b   : >> { %5851 = vmatprep.mubr.msk.f32.mxu1 %vm250_vm0, %v5442_v5  ;;  %5871 = vmatprep.mubr.msk.f32.mxu0 %vm250_vm0, %v5459_v6  ;;  %v5460_v8 = vld [vmem:[%s6591_s14 + $0x1b] sm:$0xff]  ;;  %v310_v13 = vld [vmem:[%s6591_s14 + $0x8] sm:$0xff]  ;;  %v5454_v21 = vld [vmem:[%s6591_s14 + $0x12] sm:$0xff]  ;;  %1122 = vst.msk [vmem:[#allocation3 + $0x8] sm:$0xff] (%p303_p11), %vm250_vm0, %v6366_v0 }
  0x2c   : >> { %v309_v9 = vld [vmem:[%s6591_s14] sm:$0xff]  ;;  %v5464_v10 = vld [vmem:[%s6591_s14 + $0x14] sm:$0xff]  ;;  %5852 = vmatmul.mubr.msk.f32.vlgmr.msra.gmra.mrb[0].mxu1 %vm250_vm0, %v5443_v7  ;;  %5872 = vmatmul.mubr.msk.f32.vlgmr.msra.gmra.mrb[0].mxu0 %vm250_vm0, %v5460_v8  ;;  %v5450_v19 = vld [vmem:[%s6591_s14 + $0xa] sm:$0xff]  ;;  %1123 = vst.msk [vmem:[#allocation3 + $0x10] sm:$0xff] (%p303_p11), %vm250_vm0, %v6366_v0 }
  0x2d   : >> { %5875 = vmatpush3.msra.mxu0 %v5466_v3  ;;  %5855 = vmatpush3.msra.mxu1 %v311_v4  ;;  %v5465_v14 = vld [vmem:[%s6591_s14 + $0x1c] sm:$0xff]  ;;  %v5469_v16 = vld [vmem:[%s6591_s14 + $0x24] sm:$0xff]  ;;  %v5470_v20 = vld [vmem:[%s6591_s14 + $0x2c] sm:$0xff]  ;;  %1124 = vst.msk [vmem:[#allocation3 + $0x18] sm:$0xff] (%p303_p11), %vm250_vm0, %v6366_v0 }
  0x2e   : >> { %5856 = vmatprep.mubr.msk.f32.mxu1 %vm250_vm0, %v309_v9  ;;  %5876 = vmatprep.mubr.msk.f32.mxu0 %vm250_vm0, %v5464_v10  ;;  %v5449_v15 = vld [vmem:[%s6591_s14 + $0x2] sm:$0xff]  ;;  %v5456_v18 = vld [vmem:[%s7173_s1 + $0x18] sm:$0xff]  ;;  %v5475_v25 = vld [vmem:[%s6591_s14 + $0x2d] sm:$0xff]  ;;  %1125 = vst.msk [vmem:[#allocation3 + $0x20] sm:$0xff] (%p303_p11), %vm250_vm0, %v6366_v0 }
  0x2f   : >> { %5879 = vmatprep.subr.mxu0 %v5471_v11  ;;  %5859 = vmatprep.subr.mxu1 %v5451_v12  ;;  %v5474_v22 = vld [vmem:[%s6591_s14 + $0x25] sm:$0xff]  ;;  %v5455_v24 = vld [vmem:[%s6591_s14 + $0x1a] sm:$0xff]  ;;  %v5480_v27 = vld [vmem:[%s6591_s14 + $0x2e] sm:$0xff]  ;;  %1126 = vst.msk [vmem:[#allocation3 + $0x28] sm:$0xff] (%p303_p11), %vm250_vm0, %v6366_v0 }
  0x30   : >> { %v5479_v26 = vld [vmem:[%s6591_s14 + $0x26] sm:$0xff]  ;;  %v5484_v31 = vld [vmem:[%s7174_s2] ss:$0 sm:$0xff]  ;;  %1127 = vst.msk [vmem:[#allocation3 + $0x30] sm:$0xff] (%p303_p11), %vm250_vm0, %v6366_v0  ;;  %1128 = vst.msk [vmem:[#allocation3 + $0x38] sm:$0xff] (%p303_p11), %vm250_vm0, %v6366_v0 }
  0x31   : > { %1129 = vst.msk [vmem:[#allocation3 + $0x40] sm:$0xff] (%p303_p11), %vm250_vm0, %v6366_v0  ;;  %1130 = vst.msk [vmem:[#allocation3 + $0x48] sm:$0xff] (%p303_p11), %vm250_vm0, %v6366_v0 }
  0x32   : > { %1131 = vst.msk [vmem:[#allocation3 + $0x50] sm:$0xff] (%p303_p11), %vm250_vm0, %v6366_v0  ;;  %1132 = vst.msk [vmem:[#allocation3 + $0x58] sm:$0xff] (%p303_p11), %vm250_vm0, %v6366_v0 }
  0x33   : > { %1133 = vst.msk [vmem:[#allocation3 + $0x60] sm:$0xff] (%p303_p11), %vm250_vm0, %v6366_v0  ;;  %1134 = vst.msk [vmem:[#allocation3 + $0x68] sm:$0xff] (%p303_p11), %vm250_vm0, %v6366_v0 }
  0x34   : >> { %5857 = vmatmul.mubr.msk.f32.vlgmr.msra.gmra.mrb[0].mxu1 %vm250_vm0, %v310_v13  ;;  %5877 = vmatmul.mubr.msk.f32.vlgmr.msra.gmra.mrb[0].mxu0 %vm250_vm0, %v5465_v14  ;;  %1135 = vst.msk [vmem:[#allocation3 + $0x70] sm:$0xff] (%p303_p11), %vm250_vm0, %v6366_v0  ;;  %1136 = vst.msk [vmem:[#allocation3 + $0x78] sm:$0xff] (%p303_p11), %vm250_vm0, %v6366_v0 }
  0x35   : >> { %5880 = vmatpush3.msra.mxu0 %v5471_v11  ;;  %5860 = vmatpush3.msra.mxu1 %v5451_v12  ;;  %1137 = vst.msk [vmem:[#allocation3 + $0x80] sm:$0xff] (%p303_p11), %vm250_vm0, %v6366_v0  ;;  %1138 = vst.msk [vmem:[#allocation3 + $0x88] sm:$0xff] (%p303_p11), %vm250_vm0, %v6366_v0 }
  0x36   : >> { %5861 = vmatprep.mubr.msk.f32.mxu1 %vm250_vm0, %v5449_v15  ;;  %5881 = vmatprep.mubr.msk.f32.mxu0 %vm250_vm0, %v5469_v16 }
  0x37   : >> { %5884 = vmatprep.subr.mxu0 %v5476_v17  ;;  %5864 = vmatprep.subr.mxu1 %v5456_v18 }
  0x3c   : >> { %5862 = vmatmul.mubr.msk.f32.vlgmr.msra.gmra.mrb[0].mxu1 %vm250_vm0, %v5450_v19  ;;  %5882 = vmatmul.mubr.msk.f32.vlgmr.msra.gmra.mrb[0].mxu0 %vm250_vm0, %v5470_v20 }
  0x3d   : >> { %5885 = vmatpush3.msra.mxu0 %v5476_v17  ;;  %5865 = vmatpush3.msra.mxu1 %v5456_v18 }
  0x3e   : >> { %5866 = vmatprep.mubr.msk.f32.mxu1 %vm250_vm0, %v5454_v21  ;;  %5886 = vmatprep.mubr.msk.f32.mxu0 %vm250_vm0, %v5474_v22 }
  0x3f   : >> { %5889 = vmatprep.subr.mxu0 %v5481_v23 }
  0x44   : >> { %5867 = vmatmul.mubr.msk.f32.vlgmr.msra.gmra.mrb[0].mxu1 %vm250_vm0, %v5455_v24  ;;  %5887 = vmatmul.mubr.msk.f32.vlgmr.msra.gmra.mrb[0].mxu0 %vm250_vm0, %v5475_v25 }
  0x45   : >> { %5890 = vmatpush3.msra.mxu0 %v5481_v23  ;;  %5891 = vmatprep.mubr.msk.f32.mxu0 %vm250_vm0, %v5479_v26 }
  0x4c   : >> { %5892 = vmatmul.mubr.msk.f32.vlgmr.msra.gmra.mrb[0].mxu0 %vm250_vm0, %v5480_v27 }
 0x117   : >> { %v5868_v28 = vpop.f32.mrb[0].mxu1 }
 0x118   : >> { %v648_v29 = vpop.f32.mrb[1].mxu1 }
 0x11f   : >> { %v5893_v30 = vpop.f32.mrb[0].mxu0 }
 0x120   : >> { %v6144_v32 = vadd.f32 %v5893_v30, %v5868_v28  ;;  %v1094_v33 = vpop.f32.mrb[1].mxu0 }
 0x121   : >> { %v6145_v34 = vadd.f32 %v1094_v33, %v648_v29  ;;  %305 = sbr.rel (!%p303_p11) target bundleno = 39 (0x27), region = 218 }
 0x122   : >> { %v1113_v35 = vadd.f32 %v6144_v32, %v5484_v31 }
 0x123   : >> { %v1112_v36 = vadd.f32 %v6145_v34, %v5484_v31 }
 0x124   : >> { %v1115_v37 = vmax.f32 %v1113_v35, 0.0 }
 0x125   : >> { %v1114_v38 = vmax.f32 %v1112_v36, 0.0 }
 0x126   : >> { %5486 = vst.msk [vmem:[%s5197_s28 + $0x32] sm:$0xff] %vm250_vm0, %v1115_v37 }
 0x127   : >> { %5485 = vst.msk [vmem:[%s5197_s28 + $0x2a] sm:$0xff] %vm250_vm0, %v1114_v38 }
 0x128 LB: >> { %v5488_v39 = vld [vmem:[%s7175_s3 + $0x8] sm:$0xff]  ;;  %v1148_v40 = vld [vmem:[%s7175_s3] sm:$0xff]  ;;  %v6367_v41 = vmov 0.0   ;;  %vm6368_vm1 = vmmov 0   ;;  %s1145_s12 = smul.u32 40, %s6360_s15  ;;  %v5492_v42 = vld [vmem:[%s7175_s3 + $0x10] sm:$0xff]  ;;  %s6360_s15 = sphi %s6689_s15, %s1144_s15  }
 0x129   : >> { %5894 = vmatprep.subr.mxu0 %v6367_v41  ;;  %5899 = vmatprep.subr.mxu1 %v6367_v41  ;;  %v5495_v43 = vld [vmem:[%s7175_s3 + $0x18] sm:$0xff]  ;;  %v5498_v48 = vld [vmem:[%s7175_s3 + $0x20] sm:$0xff]  ;;  %v5503_v49 = vld [vmem:[%s7175_s3 + $0x28] sm:$0xff]  ;;  %s5293_s29 = smul.u32 12, %s6360_s15  ;;  %s1144_s15 = sadd.s32 1, %s6360_s15  }
 0x12a   : >> { %5895 = vmatpush3.msra.mxu0 %v5488_v39  ;;  %5896 = vmatprep.mubr.msk.f32.mxu0 %vm6368_vm1, %v6367_v41  ;;  %s6715_s26 = scalar_lea.vmem [#allocation2], %s1145_s12  ;;  %v5508_v52 = vld [vmem:[%s7175_s3 + $0x30] sm:$0xff]  ;;  %v5513_v53 = vld [vmem:[%s7175_s3 + $0x38] sm:$0xff]  ;;  %v5518_v56 = vld [vmem:[%s7175_s3 + $0x40] sm:$0xff]  ;;  %p1141_p12 = scmp.ge.s32.totalorder %s1144_s15, 8  }
 0x12b   : >> { %5900 = vmatpush3.msra.mxu1 %v1148_v40  ;;  %5901 = vmatprep.mubr.msk.f32.mxu1 %vm6368_vm1, %v6367_v41  ;;  %v5523_v57 = vld [vmem:[%s7175_s3 + $0x48] sm:$0xff]  ;;  %v5528_v60 = vld [vmem:[%s7175_s3 + $0x50] sm:$0xff]  ;;  %v5533_v61 = vld [vmem:[%s7175_s3 + $0x58] sm:$0xff]  ;;  %s5294_s11 = scalar_lea.vmem [#allocation3], %s5293_s29  ;;  %s6905_s12 = smov (%p1141_p12), 0  }
 0x12c   : >> { %5904 = vmatprep.subr.mxu0 %v6367_v41  ;;  %5909 = vmatprep.subr.mxu1 %v6367_v41  ;;  %v5538_v0 = vld [vmem:[%s7175_s3 + $0x60] sm:$0xff]  ;;  %v5543_v1 = vld [vmem:[%s7175_s3 + $0x68] sm:$0xff]  ;;  %v5548_v4 = vld [vmem:[%s7175_s3 + $0x70] sm:$0xff] }
 0x12d   : >> { %v5553_v5 = vld [vmem:[%s7175_s3 + $0x78] sm:$0xff]  ;;  %v5558_v8 = vld [vmem:[%s7175_s3 + $0x80] sm:$0xff]  ;;  %v5563_v9 = vld [vmem:[%s7175_s3 + $0x88] sm:$0xff] }
 0x12e   : >> { %v5487_v44 = vld [vmem:[%s6715_s26 + $0x1] ss:$2 sm:$0xff]  ;;  %v1147_v45 = vld [vmem:[%s6715_s26] ss:$2 sm:$0xff]  ;;  %v5568_v12 = vld [vmem:[%s7175_s3 + $0x90] sm:$0xff] }
 0x12f   : >> { %5897 = vmatmul.mubr.msk.f32.vlgmr.msra.gmra.mrb[0].mxu0 %vm250_vm0, %v5487_v44  ;;  %5902 = vmatmul.mubr.msk.f32.vlgmr.msra.gmra.mrb[0].mxu1 %vm250_vm0, %v1147_v45  ;;  %v5491_v46 = vld [vmem:[%s6715_s26 + $0x2] ss:$2 sm:$0xff]  ;;  %v5494_v47 = vld [vmem:[%s6715_s26 + $0x3] ss:$2 sm:$0xff]  ;;  %v5573_v13 = vld [vmem:[%s7175_s3 + $0x98] sm:$0xff] }
 0x130   : >> { %5905 = vmatpush3.msra.mxu0 %v5492_v42  ;;  %5910 = vmatpush3.msra.mxu1 %v5495_v43  ;;  %v5497_v50 = vld [vmem:[%s6715_s26 + $0x4] ss:$2 sm:$0xff]  ;;  %v5502_v51 = vld [vmem:[%s6715_s26 + $0x14] ss:$2 sm:$0xff]  ;;  %v5507_v54 = vld [vmem:[%s6715_s26 + $0x15] ss:$2 sm:$0xff] }
 0x131   : >> { %5906 = vmatprep.mubr.msk.f32.mxu0 %vm6368_vm1, %v6367_v41  ;;  %5914 = vmatprep.subr.mxu0 %v6367_v41  ;;  %v5512_v55 = vld [vmem:[%s6715_s26 + $0x16] ss:$2 sm:$0xff]  ;;  %v5517_v58 = vld [vmem:[%s6715_s26 + $0x17] ss:$2 sm:$0xff]  ;;  %v5583_v17 = vld [vmem:[%s7175_s3 + $0xa8] sm:$0xff] }
 0x132   : >> { %5911 = vmatprep.mubr.msk.f32.mxu1 %vm6368_vm1, %v6367_v41  ;;  %5919 = vmatprep.subr.mxu1 %v6367_v41  ;;  %v5522_v59 = vld [vmem:[%s6715_s26 + $0x18] ss:$2 sm:$0xff]  ;;  %v5527_v62 = vld [vmem:[%s6715_s26 + $0x28] ss:$2 sm:$0xff]  ;;  %v5532_v63 = vld [vmem:[%s6715_s26 + $0x29] ss:$2 sm:$0xff] }
 0x133   : >> { %5907 = vmatmul.mubr.msk.f32.vlgmr.msra.gmra.mrb[2].mxu0 %vm250_vm0, %v5491_v46  ;;  %5912 = vmatmul.mubr.msk.f32.vlgmr.msra.gmra.mrb[2].mxu1 %vm250_vm0, %v5494_v47  ;;  %v5537_v2 = vld [vmem:[%s6715_s26 + $0x2a] ss:$2 sm:$0xff]  ;;  %v5542_v3 = vld [vmem:[%s6715_s26 + $0x2b] ss:$2 sm:$0xff]  ;;  %v5578_v16 = vld [vmem:[%s7175_s3 + $0xa0] sm:$0xff] }
 0x134   : >> { %5915 = vmatpush3.msra.mxu0 %v5498_v48  ;;  %5920 = vmatpush3.msra.mxu1 %v5503_v49  ;;  %v5547_v6 = vld [vmem:[%s6715_s26 + $0x2c] ss:$2 sm:$0xff]  ;;  %v5552_v7 = vld [vmem:[%s6715_s26 + $0x3c] ss:$2 sm:$0xff]  ;;  %v5557_v10 = vld [vmem:[%s6715_s26 + $0x3d] ss:$2 sm:$0xff] }
 0x135   : >> { %5916 = vmatprep.mubr.msk.f32.mxu0 %vm6368_vm1, %v6367_v41  ;;  %5924 = vmatprep.subr.mxu0 %v6367_v41  ;;  %v5562_v11 = vld [vmem:[%s6715_s26 + $0x3e] ss:$2 sm:$0xff]  ;;  %v5567_v14 = vld [vmem:[%s6715_s26 + $0x3f] ss:$2 sm:$0xff]  ;;  %v5588_v20 = vld [vmem:[%s7175_s3 + $0xb0] sm:$0xff] }
 0x136   : >> { %5921 = vmatprep.mubr.msk.f32.mxu1 %vm6368_vm1, %v6367_v41  ;;  %5929 = vmatprep.subr.mxu1 %v6367_v41  ;;  %v5572_v15 = vld [vmem:[%s6715_s26 + $0x40] ss:$2 sm:$0xff]  ;;  %v5577_v18 = vld [vmem:[%s6715_s26 + $0x50] ss:$2 sm:$0xff]  ;;  %v5582_v19 = vld [vmem:[%s6715_s26 + $0x51] ss:$2 sm:$0xff] }
 0x137   : >> { %5917 = vmatmul.mubr.msk.f32.vlgmr.msra.gmra.mrb[4].mxu0 %vm250_vm0, %v5497_v50  ;;  %5922 = vmatmul.mubr.msk.f32.vlgmr.msra.gmra.mrb[4].mxu1 %vm250_vm0, %v5502_v51  ;;  %v5593_v21 = vld [vmem:[%s7175_s3 + $0xb8] sm:$0xff]  ;;  %v5598_v24 = vld [vmem:[%s7175_s3 + $0xc0] sm:$0xff] }
 0x138   : >> { %5925 = vmatpush3.msra.mxu0 %v5508_v52  ;;  %5930 = vmatpush3.msra.mxu1 %v5513_v53  ;;  %v5587_v22 = vld [vmem:[%s6715_s26 + $0x52] ss:$2 sm:$0xff]  ;;  %v5592_v23 = vld [vmem:[%s6715_s26 + $0x53] ss:$2 sm:$0xff] }
 0x139   : >> { %5926 = vmatprep.mubr.msk.f32.mxu0 %vm6368_vm1, %v6367_v41  ;;  %5934 = vmatprep.subr.mxu0 %v6367_v41  ;;  %v5597_v25 = vld [vmem:[%s6715_s26 + $0x54] ss:$2 sm:$0xff] }
 0x13a   : >> { %5931 = vmatprep.mubr.msk.f32.mxu1 %vm6368_vm1, %v6367_v41  ;;  %5939 = vmatprep.subr.mxu1 %v6367_v41 }
 0x13b   : >> { %5927 = vmatmul.mubr.msk.f32.vlgmr.msra.gmra.mrb[6].mxu0 %vm250_vm0, %v5507_v54  ;;  %5932 = vmatmul.mubr.msk.f32.vlgmr.msra.gmra.mrb[6].mxu1 %vm250_vm0, %v5512_v55 }
 0x13c   : >> { %5935 = vmatpush3.msra.mxu0 %v5518_v56  ;;  %5940 = vmatpush3.msra.mxu1 %v5523_v57 }
 0x13d   : >> { %5936 = vmatprep.mubr.msk.f32.mxu0 %vm6368_vm1, %v6367_v41  ;;  %5944 = vmatprep.subr.mxu0 %v6367_v41 }
 0x13e   : >> { %5941 = vmatprep.mubr.msk.f32.mxu1 %vm6368_vm1, %v6367_v41  ;;  %5949 = vmatprep.subr.mxu1 %v6367_v41 }
 0x13f   : >> { %5937 = vmatmul.mubr.msk.f32.vlgmr.msra.gmra.mrb[8].mxu0 %vm250_vm0, %v5517_v58  ;;  %5942 = vmatmul.mubr.msk.f32.vlgmr.msra.gmra.mrb[8].mxu1 %vm250_vm0, %v5522_v59 }
 0x140   : >> { %5945 = vmatpush3.msra.mxu0 %v5528_v60  ;;  %5950 = vmatpush3.msra.mxu1 %v5533_v61 }
 0x141   : >> { %5946 = vmatprep.mubr.msk.f32.mxu0 %vm6368_vm1, %v6367_v41  ;;  %5954 = vmatprep.subr.mxu0 %v6367_v41 }
 0x142   : >> { %5951 = vmatprep.mubr.msk.f32.mxu1 %vm6368_vm1, %v6367_v41  ;;  %5959 = vmatprep.subr.mxu1 %v6367_v41 }
 0x143   : >> { %5947 = vmatmul.mubr.msk.f32.vlgmr.msra.gmra.mrb[10].mxu0 %vm250_vm0, %v5527_v62  ;;  %5952 = vmatmul.mubr.msk.f32.vlgmr.msra.gmra.mrb[10].mxu1 %vm250_vm0, %v5532_v63 }
 0x144   : >> { %5955 = vmatpush3.msra.mxu0 %v5538_v0  ;;  %5960 = vmatpush3.msra.mxu1 %v5543_v1 }
 0x145   : >> { %5956 = vmatprep.mubr.msk.f32.mxu0 %vm6368_vm1, %v6367_v41  ;;  %5964 = vmatprep.subr.mxu0 %v6367_v41 }
 0x146   : >> { %5961 = vmatprep.mubr.msk.f32.mxu1 %vm6368_vm1, %v6367_v41  ;;  %5969 = vmatprep.subr.mxu1 %v6367_v41 }
 0x147   : >> { %5957 = vmatmul.mubr.msk.f32.vlgmr.msra.gmra.mrb[12].mxu0 %vm250_vm0, %v5537_v2  ;;  %5962 = vmatmul.mubr.msk.f32.vlgmr.msra.gmra.mrb[12].mxu1 %vm250_vm0, %v5542_v3 }
 0x148   : >> { %5965 = vmatpush3.msra.mxu0 %v5548_v4  ;;  %5970 = vmatpush3.msra.mxu1 %v5553_v5 }
 0x149   : >> { %5966 = vmatprep.mubr.msk.f32.mxu0 %vm6368_vm1, %v6367_v41  ;;  %5974 = vmatprep.subr.mxu0 %v6367_v41 }
 0x14a   : >> { %5971 = vmatprep.mubr.msk.f32.mxu1 %vm6368_vm1, %v6367_v41  ;;  %5979 = vmatprep.subr.mxu1 %v6367_v41 }
 0x14b   : >> { %5967 = vmatmul.mubr.msk.f32.vlgmr.msra.gmra.mrb[14].mxu0 %vm250_vm0, %v5547_v6  ;;  %5972 = vmatmul.mubr.msk.f32.vlgmr.msra.gmra.mrb[14].mxu1 %vm250_vm0, %v5552_v7 }
 0x14c   : >> { %5975 = vmatpush3.msra.mxu0 %v5558_v8  ;;  %5980 = vmatpush3.msra.mxu1 %v5563_v9 }
 0x14d   : >> { %5976 = vmatprep.mubr.msk.f32.mxu0 %vm6368_vm1, %v6367_v41  ;;  %5984 = vmatprep.subr.mxu0 %v6367_v41 }
 0x14e   : >> { %5981 = vmatprep.mubr.msk.f32.mxu1 %vm6368_vm1, %v6367_v41  ;;  %5989 = vmatprep.subr.mxu1 %v6367_v41 }
 0x14f   : >> { %5977 = vmatmul.mubr.msk.f32.vlgmr.msra.gmra.mrb[16].mxu0 %vm250_vm0, %v5557_v10  ;;  %5982 = vmatmul.mubr.msk.f32.vlgmr.msra.gmra.mrb[16].mxu1 %vm250_vm0, %v5562_v11 }
 0x150   : >> { %5985 = vmatpush3.msra.mxu0 %v5568_v12  ;;  %5990 = vmatpush3.msra.mxu1 %v5573_v13 }
 0x151   : >> { %5986 = vmatprep.mubr.msk.f32.mxu0 %vm6368_vm1, %v6367_v41  ;;  %5994 = vmatprep.subr.mxu0 %v6367_v41 }
 0x152   : >> { %5991 = vmatprep.mubr.msk.f32.mxu1 %vm6368_vm1, %v6367_v41  ;;  %5999 = vmatprep.subr.mxu1 %v6367_v41 }
 0x153   : >> { %5987 = vmatmul.mubr.msk.f32.vlgmr.msra.gmra.mrb[18].mxu0 %vm250_vm0, %v5567_v14  ;;  %5992 = vmatmul.mubr.msk.f32.vlgmr.msra.gmra.mrb[18].mxu1 %vm250_vm0, %v5572_v15 }
 0x154   : >> { %5995 = vmatpush3.msra.mxu0 %v5578_v16  ;;  %6000 = vmatpush3.msra.mxu1 %v5583_v17 }
 0x155   : >> { %5996 = vmatprep.mubr.msk.f32.mxu0 %vm6368_vm1, %v6367_v41  ;;  %6004 = vmatprep.subr.mxu0 %v6367_v41 }
 0x156   : >> { %6001 = vmatprep.mubr.msk.f32.mxu1 %vm6368_vm1, %v6367_v41  ;;  %6009 = vmatprep.subr.mxu1 %v6367_v41 }
 0x157   : >> { %5997 = vmatmul.mubr.msk.f32.vlgmr.msra.gmra.mrb[20].mxu0 %vm250_vm0, %v5577_v18  ;;  %6002 = vmatmul.mubr.msk.f32.vlgmr.msra.gmra.mrb[20].mxu1 %vm250_vm0, %v5582_v19 }
 0x158   : >> { %6005 = vmatpush3.msra.mxu0 %v5588_v20  ;;  %6010 = vmatpush3.msra.mxu1 %v5593_v21 }
 0x159   : >> { %6006 = vmatprep.mubr.msk.f32.mxu0 %vm6368_vm1, %v6367_v41  ;;  %6014 = vmatprep.subr.mxu0 %v6367_v41 }
 0x15a   : >> { %6011 = vmatprep.mubr.msk.f32.mxu1 %vm6368_vm1, %v6367_v41 }
 0x15b   : >> { %6007 = vmatmul.mubr.msk.f32.vlgmr.msra.gmra.mrb[22].mxu0 %vm250_vm0, %v5587_v22  ;;  %6012 = vmatmul.mubr.msk.f32.vlgmr.msra.gmra.mrb[22].mxu1 %vm250_vm0, %v5592_v23 }
 0x15c   : >> { %6015 = vmatpush3.msra.mxu0 %v5598_v24  ;;  %6016 = vmatprep.mubr.msk.f32.mxu0 %vm6368_vm1, %v6367_v41 }
 0x15f   : >> { %6017 = vmatmul.mubr.msk.f32.vlgmr.msra.gmra.mrb[24].mxu0 %vm250_vm0, %v5597_v25 }
 0x202   : >> { %v1223_v26 = vpop.f32.mrb[0].mxu0  ;;  %v1296_v27 = vpop.f32.mrb[0].mxu1 }
 0x203   : >> { %v1297_v28 = vadd.f32 %v1296_v27, %v1223_v26  ;;  %v5898_v29 = vpop.f32.mrb[1].mxu0  ;;  %v5903_v30 = vpop.f32.mrb[1].mxu1 }
 0x206   : >> { %v1374_v31 = vpop.f32.mrb[2].mxu0  ;;  %v1453_v32 = vpop.f32.mrb[2].mxu1 }
 0x207   : >> { %v1378_v33 = vadd.f32 %v1374_v31, %v1297_v28  ;;  %v5908_v34 = vpop.f32.mrb[3].mxu0  ;;  %v5913_v35 = vpop.f32.mrb[3].mxu1 }
 0x208   : >> { %v5600_v34 = vld [vmem:[%s7176_s4] ss:$0 sm:$0xff] }
 0x209   : >> { %v1457_v36 = vadd.f32 %v1453_v32, %v1378_v33 }
 0x20a   : >> { %v1532_v37 = vpop.f32.mrb[4].mxu0  ;;  %v1613_v38 = vpop.f32.mrb[4].mxu1 }
 0x20b   : >> { %v1536_v39 = vadd.f32 %v1532_v37, %v1457_v36  ;;  %v5918_v40 = vpop.f32.mrb[5].mxu0  ;;  %v5923_v42 = vpop.f32.mrb[5].mxu1 }
 0x20d   : >> { %v1617_v41 = vadd.f32 %v1613_v38, %v1536_v39 }
 0x20e   : >> { %v1692_v43 = vpop.f32.mrb[6].mxu0  ;;  %v1771_v44 = vpop.f32.mrb[6].mxu1 }
 0x20f   : >> { %v1696_v45 = vadd.f32 %v1692_v43, %v1617_v41  ;;  %v5928_v46 = vpop.f32.mrb[7].mxu0  ;;  %v5933_v47 = vpop.f32.mrb[7].mxu1 }
 0x211   : >> { %v1775_v48 = vadd.f32 %v1771_v44, %v1696_v45 }
 0x212   : >> { %v1850_v49 = vpop.f32.mrb[8].mxu0  ;;  %v1929_v50 = vpop.f32.mrb[8].mxu1 }
 0x213   : >> { %v1854_v51 = vadd.f32 %v1850_v49, %v1775_v48  ;;  %v5938_v52 = vpop.f32.mrb[9].mxu0  ;;  %v5943_v53 = vpop.f32.mrb[9].mxu1 }
 0x215   : >> { %v1933_v54 = vadd.f32 %v1929_v50, %v1854_v51 }
 0x216   : >> { %v2009_v55 = vpop.f32.mrb[10].mxu0  ;;  %v2088_v56 = vpop.f32.mrb[10].mxu1 }
 0x217   : >> { %v2013_v57 = vadd.f32 %v2009_v55, %v1933_v54  ;;  %v5948_v58 = vpop.f32.mrb[11].mxu0  ;;  %v5953_v59 = vpop.f32.mrb[11].mxu1 }
 0x219   : >> { %v2092_v60 = vadd.f32 %v2088_v56, %v2013_v57 }
 0x21a   : >> { %v2167_v61 = vpop.f32.mrb[12].mxu0  ;;  %v2246_v62 = vpop.f32.mrb[12].mxu1 }
 0x21b   : >> { %v2171_v63 = vadd.f32 %v2167_v61, %v2092_v60  ;;  %v5958_v0 = vpop.f32.mrb[13].mxu0  ;;  %v5963_v1 = vpop.f32.mrb[13].mxu1 }
 0x21d   : >> { %v2250_v2 = vadd.f32 %v2246_v62, %v2171_v63 }
 0x21e   : >> { %v2325_v3 = vpop.f32.mrb[14].mxu0  ;;  %v2405_v4 = vpop.f32.mrb[14].mxu1 }
 0x21f   : >> { %v2329_v5 = vadd.f32 %v2325_v3, %v2250_v2  ;;  %v5968_v6 = vpop.f32.mrb[15].mxu0  ;;  %v5973_v7 = vpop.f32.mrb[15].mxu1 }
 0x221   : >> { %v2409_v8 = vadd.f32 %v2405_v4, %v2329_v5 }
 0x222   : >> { %v2484_v9 = vpop.f32.mrb[16].mxu0  ;;  %v2563_v10 = vpop.f32.mrb[16].mxu1 }
 0x223   : >> { %v2488_v11 = vadd.f32 %v2484_v9, %v2409_v8  ;;  %v5978_v12 = vpop.f32.mrb[17].mxu0  ;;  %v5983_v13 = vpop.f32.mrb[17].mxu1 }
 0x225   : >> { %v2567_v14 = vadd.f32 %v2563_v10, %v2488_v11 }
 0x226   : >> { %v2642_v15 = vpop.f32.mrb[18].mxu0  ;;  %v2721_v16 = vpop.f32.mrb[18].mxu1 }
 0x227   : >> { %v2646_v17 = vadd.f32 %v2642_v15, %v2567_v14  ;;  %v5988_v18 = vpop.f32.mrb[19].mxu0  ;;  %v5993_v19 = vpop.f32.mrb[19].mxu1 }
 0x229   : >> { %v2725_v20 = vadd.f32 %v2721_v16, %v2646_v17 }
 0x22a   : >> { %v2801_v21 = vpop.f32.mrb[20].mxu0  ;;  %v2880_v22 = vpop.f32.mrb[20].mxu1 }
 0x22b   : >> { %v2805_v23 = vadd.f32 %v2801_v21, %v2725_v20  ;;  %v5998_v24 = vpop.f32.mrb[21].mxu0  ;;  %v6003_v25 = vpop.f32.mrb[21].mxu1 }
 0x22d   : >> { %v2884_v26 = vadd.f32 %v2880_v22, %v2805_v23 }
 0x22e   : >> { %v2959_v27 = vpop.f32.mrb[22].mxu0  ;;  %v3038_v28 = vpop.f32.mrb[22].mxu1 }
 0x22f   : >> { %v2963_v29 = vadd.f32 %v2959_v27, %v2884_v26  ;;  %v6008_v30 = vpop.f32.mrb[23].mxu0  ;;  %v6013_v31 = vpop.f32.mrb[23].mxu1 }
 0x231   : >> { %v3042_v32 = vadd.f32 %v3038_v28, %v2963_v29 }
 0x232   : >> { %v3117_v33 = vpop.f32.mrb[24].mxu0 }
 0x233   : >> { %v3121_v35 = vadd.f32 %v3117_v33, %v3042_v32  ;;  %v6018_v36 = vpop.f32.mrb[25].mxu0  ;;  %1143 = sbr.rel (!%p1141_p12) target bundleno = 296 (0x128), region = 229 }
 0x235   : >> { %v3129_v37 = vadd.f32 %v5600_v34, %v3121_v35 }
 0x237   : >> { %v3130_v38 = vmax.f32 %v3129_v37, 0.0 }
 0x239   : >> { %5601 = vst.msk [vmem:[%s5294_s11 + $0x1a] sm:$0xff] %vm250_vm0, %v3130_v38 }
 0x23a LB: >> { %v5653_v39 = vld [vmem:[%s7177_s5 + $0x60] sm:$0xff]  ;;  %v5603_v40 = vld [vmem:[%s7177_s5 + $0x8] sm:$0xff]  ;;  %v6369_v42 = vmov 0.0   ;;  %s3142_s15 = smul.u32 24, %s6364_s12  ;;  %vm6370_vm2 = vmmov 0   ;;  %v5663_v48 = vld [vmem:[%s7177_s5 + $0x70] sm:$0xff]  ;;  %s6364_s12 = sphi %s6905_s12, %s3141_s12  }
 0x23b   : >> { %6079 = vmatprep.subr.mxu0 %v6369_v42  ;;  %6019 = vmatprep.subr.mxu1 %v6369_v42  ;;  %v5658_v41 = vld [vmem:[%s7177_s5 + $0x68] sm:$0xff]  ;;  %v3145_v43 = vld [vmem:[%s7177_s5] sm:$0xff]  ;;  %v5607_v49 = vld [vmem:[%s7177_s5 + $0x10] sm:$0xff]  ;;  %s5715_s18 = sshll.u32 %s6364_s12, 2  ;;  %vm5121_vm3 = vcmask 60416   ;;  %s3141_s12 = sadd.s32 1, %s6364_s12  }
 0x23c   : >> { %6080 = vmatpush3.msra.mxu0 %v5653_v39  ;;  %6020 = vmatpush3.msra.mxu1 %v5603_v40  ;;  %s6931_s29 = scalar_lea.vmem [#allocation3], %s3142_s15  ;;  %v5668_v52 = vld [vmem:[%s7177_s5 + $0x78] sm:$0xff]  ;;  %v5673_v56 = vld [vmem:[%s7177_s5 + $0x80] sm:$0xff]  ;;  %v5678_v60 = vld [vmem:[%s7177_s5 + $0x88] sm:$0xff]  ;;  %s5120_s19 = scalar_lea.vmem %s244_s16, %s5715_s18 [#allocation4] }
 0x23d   : >> { %6021 = vmatprep.mubr.msk.f32.mxu1 %vm6370_vm2, %v6369_v42  ;;  %6081 = vmatprep.mubr.msk.f32.mxu0 %vm6370_vm2, %v6369_v42  ;;  %v5610_v53 = vld [vmem:[%s7177_s5 + $0x18] sm:$0xff]  ;;  %v5613_v57 = vld [vmem:[%s7177_s5 + $0x20] sm:$0xff]  ;;  %v5618_v61 = vld [vmem:[%s7177_s5 + $0x28] sm:$0xff]  ;;  %p3138_p13 = scmp.ge.s32.totalorder %s3141_s12, 4  }
 0x23e   : >> { %6084 = vmatprep.subr.mxu0 %v6369_v42  ;;  %6024 = vmatprep.subr.mxu1 %v6369_v42  ;;  %v5683_v0 = vld [vmem:[%s7177_s5 + $0x90] sm:$0xff]  ;;  %v5688_v4 = vld [vmem:[%s7177_s5 + $0x98] sm:$0xff]  ;;  %v5693_v8 = vld [vmem:[%s7177_s5 + $0xa0] sm:$0xff]  ;;  %s5137_s17 = sshll.u32 (%p3138_p13), %s244_s16, 4  ;;  %s7131_s12 = scalar_lea.sflag (%p3138_p13), [#allocation5], %s242_s9  ;;  %s7127_s17 = int_to_ptr.vmem [resolvable:$true] %s5137_s17 }
 0x23f   : >> { %v5623_v1 = vld [vmem:[%s7177_s5 + $0x30] sm:$0xff]  ;;  %v5628_v5 = vld [vmem:[%s7177_s5 + $0x38] sm:$0xff]  ;;  %v5633_v9 = vld [vmem:[%s7177_s5 + $0x40] sm:$0xff]  ;;  %s6278_s26 = scalar_lea.vmem (%p3138_p13), %s7127_s17, 256 }
 0x240   : >> { %v5602_v44 = vld [vmem:[%s6931_s29 + $0x1] ss:$2 sm:$0xf]  ;;  %v5652_v45 = vld [vmem:[%s6931_s29 + $0x1a] ss:$2 sm:$0xf]  ;;  %p6279_p0 = scmp.ne.s32.totalorder (%p3138_p13), %s7127_s17, %s6278_s26 }
 0x241   : >> { %6022 = vmatmul.mubr.msk.f32.vlgmr.msra.gmra.mrb[0].mxu1 %vm250_vm0, %v5602_v44  ;;  %6082 = vmatmul.mubr.msk.f32.vlgmr.msra.gmra.mrb[0].mxu0 %vm250_vm0, %v5652_v45  ;;  %v3144_v46 = vld [vmem:[%s6931_s29] ss:$2 sm:$0xf]  ;;  %v5657_v47 = vld [vmem:[%s6931_s29 + $0x1b] ss:$2 sm:$0xf] }
 0x242   : >> { %6085 = vmatpush3.msra.mxu0 %v5658_v41  ;;  %6025 = vmatpush3.msra.mxu1 %v3145_v43  ;;  %v5606_v50 = vld [vmem:[%s6931_s29 + $0x2] ss:$2 sm:$0xf]  ;;  %v5609_v54 = vld [vmem:[%s6931_s29 + $0x3] ss:$2 sm:$0xf]  ;;  %p6280_p1 = pnand (%p3138_p13), %p6279_p0, %p6447_p5 }
 0x243   : >> { %6026 = vmatprep.mubr.msk.f32.mxu1 %vm6370_vm2, %v6369_v42  ;;  %6086 = vmatprep.mubr.msk.f32.mxu0 %vm6370_vm2, %v6369_v42  ;;  %v5662_v51 = vld [vmem:[%s6931_s29 + $0x1c] ss:$2 sm:$0xf]  ;;  %v5667_v55 = vld [vmem:[%s6931_s29 + $0x24] ss:$2 sm:$0xf] }
 0x244   : >> { %6089 = vmatprep.subr.mxu0 %v6369_v42  ;;  %6029 = vmatprep.subr.mxu1 %v6369_v42  ;;  %v5612_v58 = vld [vmem:[%s6931_s29 + $0x4] ss:$2 sm:$0xf]  ;;  %v5672_v59 = vld [vmem:[%s6931_s29 + $0x25] ss:$2 sm:$0xf]  ;;  %p6281_p2 = pneg (%p3138_p13), %p6280_p1 }
 0x245   : >> { %v5617_v62 = vld [vmem:[%s6931_s29 + $0xc] ss:$2 sm:$0xf]  ;;  %v5622_v2 = vld [vmem:[%s6931_s29 + $0xd] ss:$2 sm:$0xf] }
 0x246   : >> { %v5677_v63 = vld [vmem:[%s6931_s29 + $0x26] ss:$2 sm:$0xf]  ;;  %v5682_v3 = vld [vmem:[%s6931_s29 + $0x27] ss:$2 sm:$0xf] }
 0x247   : >> { %v5627_v6 = vld [vmem:[%s6931_s29 + $0xe] ss:$2 sm:$0xf]  ;;  %v5632_v10 = vld [vmem:[%s6931_s29 + $0xf] ss:$2 sm:$0xf] }
 0x248   : >> { %v5687_v7 = vld [vmem:[%s6931_s29 + $0x28] ss:$2 sm:$0xf]  ;;  %v5692_v11 = vld [vmem:[%s6931_s29 + $0x30] ss:$2 sm:$0xf] }
 0x249   : >> { %6027 = vmatmul.mubr.msk.f32.vlgmr.msra.gmra.mrb[0].mxu1 %vm250_vm0, %v3144_v46  ;;  %6087 = vmatmul.mubr.msk.f32.vlgmr.msra.gmra.mrb[0].mxu0 %vm250_vm0, %v5657_v47  ;;  %v5698_v12 = vld [vmem:[%s7177_s5 + $0xa8] sm:$0xff]  ;;  %v5637_v14 = vld [vmem:[%s6931_s29 + $0x10] ss:$2 sm:$0xf]  ;;  %v5708_v20 = vld [vmem:[%s7177_s5 + $0xb8] sm:$0xff] }
 0x24a   : >> { %6090 = vmatpush3.msra.mxu0 %v5663_v48  ;;  %6030 = vmatpush3.msra.mxu1 %v5607_v49  ;;  %v5638_v13 = vld [vmem:[%s7177_s5 + $0x48] sm:$0xff]  ;;  %v5697_v15 = vld [vmem:[%s6931_s29 + $0x31] ss:$2 sm:$0xf]  ;;  %v5648_v21 = vld [vmem:[%s7177_s5 + $0x58] sm:$0xff] }
 0x24b   : >> { %6031 = vmatprep.mubr.msk.f32.mxu1 %vm6370_vm2, %v6369_v42  ;;  %6091 = vmatprep.mubr.msk.f32.mxu0 %vm6370_vm2, %v6369_v42  ;;  %v5703_v16 = vld [vmem:[%s7177_s5 + $0xb0] sm:$0xff]  ;;  %v5642_v18 = vld [vmem:[%s6931_s29 + $0x18] ss:$2 sm:$0xf]  ;;  %v5713_v24 = vld [vmem:[%s7177_s5 + $0xc0] sm:$0xff] }
 0x24c   : >> { %6094 = vmatprep.subr.mxu0 %v6369_v42  ;;  %6034 = vmatprep.subr.mxu1 %v6369_v42  ;;  %v5643_v17 = vld [vmem:[%s7177_s5 + $0x50] sm:$0xff]  ;;  %v5647_v22 = vld [vmem:[%s6931_s29 + $0x19] ss:$2 sm:$0xf] }
 0x24d   : >> { %v5702_v19 = vld [vmem:[%s6931_s29 + $0x32] ss:$2 sm:$0xf]  ;;  %v5707_v23 = vld [vmem:[%s6931_s29 + $0x33] ss:$2 sm:$0xf] }
 0x24e   : >> { %v5712_v25 = vld [vmem:[%s6931_s29 + $0x34] ss:$2 sm:$0xf]  ;;  %s5721_s29 = sshll.u32 (%p3138_p13), %s6430_s25, 8  ;;  %s6371_s25 = smov (%p3138_p13), [#allocation4]  }
 0x24f   : > { %s7123_s28 = scalar_lea.hbm (%p3138_p13), %s7178_s6, %s5721_s29  ;;  %s6282_s14 = sshll.u32 (%p3138_p13), %s6371_s25, 4  ;;  %s6283_s14 = int_to_ptr.vmem [resolvable:$false] %s6282_s14 }
 0x250   : > { %s6284_s11 = scalar_lea.vmem (%p3138_p13), %s6283_s14, 512  ;;  %p6285_p3 = scmp.lt.s32.totalorder (%p3138_p13), %s7127_s17, %s6283_s14 }
 0x251   : >> { %6032 = vmatmul.mubr.msk.f32.vlgmr.msra.gmra.mrb[0].mxu1 %vm250_vm0, %v5606_v50  ;;  %6092 = vmatmul.mubr.msk.f32.vlgmr.msra.gmra.mrb[0].mxu0 %vm250_vm0, %v5662_v51  ;;  %p6286_p4 = scmp.lt.s32.totalorder (%p3138_p13), %s6284_s11, %s6278_s26 }
 0x252   : >> { %6095 = vmatpush3.msra.mxu0 %v5668_v52  ;;  %6035 = vmatpush3.msra.mxu1 %v5610_v53 }
 0x253   : >> { %6036 = vmatprep.mubr.msk.f32.mxu1 %vm6370_vm2, %v6369_v42  ;;  %6096 = vmatprep.mubr.msk.f32.mxu0 %vm6370_vm2, %v6369_v42  ;;  %p6287_p7 = por (%p3138_p13), %p6286_p4, %p6285_p3 }
 0x254   : >> { %6099 = vmatprep.subr.mxu0 %v6369_v42  ;;  %6039 = vmatprep.subr.mxu1 %v6369_v42 }
 0x255   : > { %p6288_p8 = pnand (%p3138_p13), %p6287_p7, %p6281_p2 }
 0x259   : >> { %6037 = vmatmul.mubr.msk.f32.vlgmr.msra.gmra.mrb[0].mxu1 %vm250_vm0, %v5609_v54  ;;  %6097 = vmatmul.mubr.msk.f32.vlgmr.msra.gmra.mrb[0].mxu0 %vm250_vm0, %v5667_v55 }
 0x25a   : >> { %6100 = vmatpush3.msra.mxu0 %v5673_v56  ;;  %6040 = vmatpush3.msra.mxu1 %v5613_v57 }
 0x25b   : >> { %6041 = vmatprep.mubr.msk.f32.mxu1 %vm6370_vm2, %v6369_v42  ;;  %6101 = vmatprep.mubr.msk.f32.mxu0 %vm6370_vm2, %v6369_v42 }
 0x25c   : >> { %6104 = vmatprep.subr.mxu0 %v6369_v42  ;;  %6044 = vmatprep.subr.mxu1 %v6369_v42 }
 0x261   : >> { %6042 = vmatmul.mubr.msk.f32.vlgmr.msra.gmra.mrb[0].mxu1 %vm250_vm0, %v5612_v58  ;;  %6102 = vmatmul.mubr.msk.f32.vlgmr.msra.gmra.mrb[0].mxu0 %vm250_vm0, %v5672_v59 }
 0x262   : >> { %6105 = vmatpush3.msra.mxu0 %v5678_v60  ;;  %6045 = vmatpush3.msra.mxu1 %v5618_v61 }
 0x263   : >> { %6046 = vmatprep.mubr.msk.f32.mxu1 %vm6370_vm2, %v6369_v42  ;;  %6106 = vmatprep.mubr.msk.f32.mxu0 %vm6370_vm2, %v6369_v42 }
 0x264   : >> { %6109 = vmatprep.subr.mxu0 %v6369_v42  ;;  %6049 = vmatprep.subr.mxu1 %v6369_v42 }
 0x269   : >> { %6047 = vmatmul.mubr.msk.f32.vlgmr.msra.gmra.mrb[0].mxu1 %vm250_vm0, %v5617_v62  ;;  %6107 = vmatmul.mubr.msk.f32.vlgmr.msra.gmra.mrb[0].mxu0 %vm250_vm0, %v5677_v63 }
 0x26a   : >> { %6110 = vmatpush3.msra.mxu0 %v5683_v0  ;;  %6050 = vmatpush3.msra.mxu1 %v5623_v1 }
 0x26b   : >> { %6051 = vmatprep.mubr.msk.f32.mxu1 %vm6370_vm2, %v6369_v42  ;;  %6111 = vmatprep.mubr.msk.f32.mxu0 %vm6370_vm2, %v6369_v42 }
 0x26c   : >> { %6114 = vmatprep.subr.mxu0 %v6369_v42  ;;  %6054 = vmatprep.subr.mxu1 %v6369_v42 }
 0x271   : >> { %6052 = vmatmul.mubr.msk.f32.vlgmr.msra.gmra.mrb[0].mxu1 %vm250_vm0, %v5622_v2  ;;  %6112 = vmatmul.mubr.msk.f32.vlgmr.msra.gmra.mrb[0].mxu0 %vm250_vm0, %v5682_v3 }
 0x272   : >> { %6115 = vmatpush3.msra.mxu0 %v5688_v4  ;;  %6055 = vmatpush3.msra.mxu1 %v5628_v5 }
 0x273   : >> { %6056 = vmatprep.mubr.msk.f32.mxu1 %vm6370_vm2, %v6369_v42  ;;  %6116 = vmatprep.mubr.msk.f32.mxu0 %vm6370_vm2, %v6369_v42 }
 0x274   : >> { %6119 = vmatprep.subr.mxu0 %v6369_v42  ;;  %6059 = vmatprep.subr.mxu1 %v6369_v42 }
 0x279   : >> { %6057 = vmatmul.mubr.msk.f32.vlgmr.msra.gmra.mrb[0].mxu1 %vm250_vm0, %v5627_v6  ;;  %6117 = vmatmul.mubr.msk.f32.vlgmr.msra.gmra.mrb[0].mxu0 %vm250_vm0, %v5687_v7 }
 0x27a   : >> { %6120 = vmatpush3.msra.mxu0 %v5693_v8  ;;  %6060 = vmatpush3.msra.mxu1 %v5633_v9 }
 0x27b   : >> { %6061 = vmatprep.mubr.msk.f32.mxu1 %vm6370_vm2, %v6369_v42  ;;  %6121 = vmatprep.mubr.msk.f32.mxu0 %vm6370_vm2, %v6369_v42 }
 0x27c   : >> { %6124 = vmatprep.subr.mxu0 %v6369_v42  ;;  %6064 = vmatprep.subr.mxu1 %v6369_v42 }
 0x281   : >> { %6062 = vmatmul.mubr.msk.f32.vlgmr.msra.gmra.mrb[0].mxu1 %vm250_vm0, %v5632_v10  ;;  %6122 = vmatmul.mubr.msk.f32.vlgmr.msra.gmra.mrb[0].mxu0 %vm250_vm0, %v5692_v11 }
 0x282   : >> { %6125 = vmatpush3.msra.mxu0 %v5698_v12  ;;  %6065 = vmatpush3.msra.mxu1 %v5638_v13 }
 0x283   : >> { %6066 = vmatprep.mubr.msk.f32.mxu1 %vm6370_vm2, %v6369_v42  ;;  %6126 = vmatprep.mubr.msk.f32.mxu0 %vm6370_vm2, %v6369_v42 }
 0x284   : >> { %6129 = vmatprep.subr.mxu0 %v6369_v42  ;;  %6069 = vmatprep.subr.mxu1 %v6369_v42 }
 0x289   : >> { %6067 = vmatmul.mubr.msk.f32.vlgmr.msra.gmra.mrb[0].mxu1 %vm250_vm0, %v5637_v14  ;;  %6127 = vmatmul.mubr.msk.f32.vlgmr.msra.gmra.mrb[0].mxu0 %vm250_vm0, %v5697_v15 }
 0x28a   : >> { %6130 = vmatpush3.msra.mxu0 %v5703_v16  ;;  %6070 = vmatpush3.msra.mxu1 %v5643_v17 }
 0x28b   : >> { %6071 = vmatprep.mubr.msk.f32.mxu1 %vm6370_vm2, %v6369_v42  ;;  %6131 = vmatprep.mubr.msk.f32.mxu0 %vm6370_vm2, %v6369_v42 }
 0x28c   : >> { %6134 = vmatprep.subr.mxu0 %v6369_v42  ;;  %6074 = vmatprep.subr.mxu1 %v6369_v42 }
 0x291   : >> { %6072 = vmatmul.mubr.msk.f32.vlgmr.msra.gmra.mrb[0].mxu1 %vm250_vm0, %v5642_v18  ;;  %6132 = vmatmul.mubr.msk.f32.vlgmr.msra.gmra.mrb[0].mxu0 %vm250_vm0, %v5702_v19 }
 0x292   : >> { %6135 = vmatpush3.msra.mxu0 %v5708_v20  ;;  %6075 = vmatpush3.msra.mxu1 %v5648_v21 }
 0x293   : >> { %6076 = vmatprep.mubr.msk.f32.mxu1 %vm6370_vm2, %v6369_v42  ;;  %6136 = vmatprep.mubr.msk.f32.mxu0 %vm6370_vm2, %v6369_v42 }
 0x294   : >> { %6139 = vmatprep.subr.mxu0 %v6369_v42 }
 0x299   : >> { %6077 = vmatmul.mubr.msk.f32.vlgmr.msra.gmra.mrb[0].mxu1 %vm250_vm0, %v5647_v22  ;;  %6137 = vmatmul.mubr.msk.f32.vlgmr.msra.gmra.mrb[0].mxu0 %vm250_vm0, %v5707_v23 }
 0x29a   : >> { %6140 = vmatpush3.msra.mxu0 %v5713_v24  ;;  %6141 = vmatprep.mubr.msk.f32.mxu0 %vm6370_vm2, %v6369_v42 }
 0x2a1   : >> { %6142 = vmatmul.mubr.msk.f32.vlgmr.msra.gmra.mrb[0].mxu0 %vm250_vm0, %v5712_v25 }
 0x36c   : >> { %v4085_v26 = vpop.f32.mrb[0].mxu1 }
 0x36d   : >> { %v6078_v27 = vpop.f32.mrb[1].mxu1 }
 0x371   : > { %3140 = sbr.rel (!%p3138_p13) target bundleno = 570 (0x23a), region = 240 }
 0x374   : >> { %v5114_v28 = vpop.f32.mrb[0].mxu0 }
 0x375   : >> { %v6160_v29 = vadd.f32 %v5114_v28, %v4085_v26  ;;  %v6143_v30 = vpop.f32.mrb[1].mxu0 }
 0x377   : >> { %5122 = vst.msk [vmem:[%s5120_s19] sm:$0xf] %vm5121_vm3, %v6160_v29 }
 0x378   : > { %6291 = shalt.err (!%p6288_p8)
}
 0x379   : > { %s6292_s9 = scalar_lea.hbm %s7123_s28, 256  ;;  %s6296_s13 = scalar_lea.hbm %s7178_s6, 512 }
 0x37a   : > { %p6293_p9 = scmp.ne.s32.totalorder %s7123_s28, %s6292_s9  ;;  %p6297_p12 = scmp.lt.u32.totalorder %s7123_s28, %s7178_s6 }
 0x37b   : > { %p6298_p13 = scmp.lt.u32.totalorder %s6296_s13, %s6292_s9  ;;  %p6300_p1 = scmp.lt.u32.totalorder %s6292_s9, %s7123_s28 }
 0x37c   : > { %p6294_p10 = pnand %p6293_p9, %p6447_p5 }
 0x37d   : > { %p6299_p0 = por %p6298_p13, %p6297_p12 }
 0x37e   : > { %p6295_p11 = pneg %p6294_p10 }
 0x37f   : > { %p6301_p2 = por %p6300_p1, %p6299_p0 }
 0x381   : > { %p6302_p3 = pnand %p6301_p2, %p6295_p11 }
 0x383   : > { %6305 = shalt.err (!%p6302_p3)
}
 0x384   : > { %s6372_s29 = smov 128   ;;  %s6373_s20 = smov 8  }
 0x385   : > { %6208 = dma.vmem_to_hbm [thread:$0]  (%p6447_p5), %s7127_s17, 256, %s7123_s28, %s7131_s12, %s6372_s29, %s6372_s29, %s6373_s20  }
 0x386 PF: > { %p6214_p4 = scmp.ge.s32.totalorder %s6352_s24, 2  ;;  %s5152_s15 = sand.u32 1, %s6340_s21  }
 0x387   : > { %s5153_s26 = scalar_lea.sflag [#allocation5], %s5152_s15 }
 0x388   : > { %p6211_p7 = pnand %p6214_p4, %p6451_p6 }
 0x38a   : > { %6335 = dma.done.wait (!%p6211_p7), %s5153_s26, 256  }
 0x38b   : > { %6337 = vsyncadd (!%p6211_p7), %s5153_s26, 4294967040  ;;  %p16_p8 = scmp.ge.s32.totalorder %s6434_s27, 4   ;;  %s7181_s21 = smov %s6344_s22 }
 0x38c   : > { %s7182_s22 = smov %s6348_s23  ;;  %s7183_s23 = smov %s6445_s30 }
 0x38d   : > { %s7184_s24 = smov %s6434_s27  ;;  %18 = sbr.rel (!%p16_p8) target bundleno = 3 (0x3), region = 251 }
 0x394   :  { %5158 = vsyncpa [#allocation5], 1 }
 0x395   :  { %5160 = vsyncpa [#allocation5 + $0x1], 1 }

</bundles_post_ra>
